<compile_context>
chip_gen: v6e
topology: v6e:2x2x1
jax: 0.10.0
libtpu: 0.0.40
codegen_flags: <defaults>
</compile_context>

<pallas_src>
import functools

import jax
import jax.numpy as jnp
from jax import lax
from jax.experimental import pallas as pl
from jax.experimental.pallas import tpu as pltpu

C_IN = 64      # resnet50.layer1[0].conv1 input channels
C_MID = 64     # conv1 output channels
C_OUT = 256    # conv3 / attention-block channels
N_HEADS = 2    # two AttentionBlocks handled together
EPS_BN = 1e-5
EPS_LN = 1e-5

# Row layout of the packed per-channel vector parameter (K_VEC, 256).
_R_BSTEM = 0        # folded stem bias (b_stem)
_R_T1B = 1          # transformer[0] bias, rows 1..2 (head 0, head 1)
_R_LNW = 3          # LayerNorm gamma, rows 3..4
_R_LNB = 5          # LayerNorm beta,  rows 5..6
_R_T2B = 7          # transformer[-1] bias, rows 7..8
_R_BCONST = 9       # b_stem @ ww_sum + b_stem + folded W-conv bias
K_VEC = 10


# --------------------------------------------------------------------------
# Pass 1: per-tile partial softmax statistics, fully parallel over (B, HW).
#   s[h, n] = x[n] . (W_stem @ cw_h)   (constant terms cancel in the softmax)
#   emits per tile: m (max), l (sum exp), acc = exp(s - m) @ x  (pooled in
#   x-space; valid because softmax weights sum to 1 and the stem is affine).
# --------------------------------------------------------------------------
def _stats_kernel(x_ref, sx_ref, acc_ref, ml_ref, *, tile, hw, mask):
    x = x_ref[0]                                              # (tile, 64)
    # (2,64) lane-dense weights, contract on the last dims -> (2, tile).
    s = lax.dot_general(sx_ref[...], x, (((1,), (1,)), ((), ())),
                        preferred_element_type=jnp.float32)   # (2, tile)
    if mask:
        col = (pl.program_id(1) * tile
               + lax.broadcasted_iota(jnp.int32, s.shape, 1))
        s = jnp.where(col < hw, s, -jnp.inf)                  # mask padded rows
    m = jnp.max(s, axis=1, keepdims=True)                     # (2, 1)
    p = jnp.exp(s - m)                                        # (2, tile)
    l = jnp.sum(p, axis=1, keepdims=True)                     # (2, 1)
    acc = jnp.dot(p.astype(x.dtype), x,
                  preferred_element_type=jnp.float32)         # (2, 64)
    acc_ref[0, 0] = acc
    ml_ref[0, 0] = jnp.concatenate([m, l], axis=1)            # (2, 2): [m, l]


# --------------------------------------------------------------------------
# Finalize (grid = (B,)): merge partial softmax stats, run both
# AttentionBlock transformers, and produce the per-batch output bias
#   bias_b = fg_1 @ wwf_1 + fg_2 @ wwf_2 + (b_stem @ ww_sum + b_stem + wbf)
# --------------------------------------------------------------------------
def _finalize_kernel(acc_ref, ml_ref, wstem_ref, t1w_ref, t2w_ref, wwf_ref,
                     vec_ref, bias_ref, *, approx):
    ml = ml_ref[0]                                     # (n_hw, 2, 2)
    m3 = ml[:, :, 0:1]                                 # (n_hw, 2, 1)
    l3 = ml[:, :, 1:2]                                 # (n_hw, 2, 1)
    m_g = jnp.max(m3, axis=0, keepdims=True)           # (1, 2, 1)
    w3 = jnp.exp(m3 - m_g)                             # (n_hw, 2, 1)
    l_g = jnp.sum(w3 * l3, axis=0)                     # (2, 1)
    acc3 = acc_ref[0]                                  # (n_hw, 2, 64)
    acc_g = jnp.sum(acc3 * w3, axis=0)                 # (2, 64)
    vec = vec_ref[...]                                 # (10, 256)

    def head(h):
        inv = pl.reciprocal(l_g[h:h + 1, :], approx=approx)        # (1, 1)
        xbar = acc_g[h:h + 1, :] * inv                             # (1, 64)
        # Attention-pooled feature of t:  xbar @ W_stem + b_stem
        feat = jnp.dot(xbar, wstem_ref[...],
                       preferred_element_type=jnp.float32)
        feat = feat + vec[_R_BSTEM:_R_BSTEM + 1]
        # transformer: conv -> LayerNorm -> ReLU -> conv
        f = jnp.dot(feat, t1w_ref[h], preferred_element_type=jnp.float32)
        f = f + vec[_R_T1B + h:_R_T1B + h + 1]
        mu = jnp.mean(f, axis=-1, keepdims=True)
        var = jnp.mean((f - mu) ** 2, axis=-1, keepdims=True)
        f = (f - mu) * lax.rsqrt(var + EPS_LN)
        f = f * vec[_R_LNW + h:_R_LNW + h + 1] + vec[_R_LNB + h:_R_LNB + h + 1]
        f = jnp.maximum(f, 0.0)
        fg = jnp.dot(f, t2w_ref[h], preferred_element_type=jnp.float32)
        fg = fg + vec[_R_T2B + h:_R_T2B + h + 1]
        # This head's contribution to the (BN-folded) W conv.
        return jnp.dot(fg, wwf_ref[h], preferred_element_type=jnp.float32)

    bias_ref[0] = head(0) + head(1) + vec[_R_BCONST:_R_BCONST + 1]


# --------------------------------------------------------------------------
# Pass 2: out = x @ W2 + bias_b.  Fully parallel over (B, HW).
# --------------------------------------------------------------------------
def _out_kernel(x_ref, w2_ref, bias_ref, o_ref):
    y = jnp.dot(x_ref[0], w2_ref[...], preferred_element_type=jnp.float32)
    o_ref[0] = (y + bias_ref[0]).astype(o_ref.dtype)


# --------------------------------------------------------------------------
# Wrapper: parameter folding / packing + the three pallas_calls.
# --------------------------------------------------------------------------
def _pick_block_hw(hw, block_hw):
    if block_hw is not None:
        assert block_hw % 8 == 0, "block_hw must be a multiple of 8"
        return block_hw
    if hw >= 1024:
        return 1024
    if hw >= 512:
        return 512
    return ((hw + 7) // 8) * 8


def _fold_params(p, matmul_dtype):
    """Fold eval-mode BNs and the residual path into the 1x1 conv weights."""
    hp = lax.Precision.HIGHEST
    # Stem: ((x @ w1) * s1 + b1) @ w3 * s3 + b3  ==  x @ W_stem + b_stem
    w_stem = jnp.dot(p["w1"] * p["bn1_s"][None, :], p["w3"], precision=hp)
    w_stem = w_stem * p["bn3_s"][None, :]                          # (64, 256)
    b_stem = jnp.dot(p["bn1_b"], p["w3"], precision=hp) * p["bn3_s"] + p["bn3_b"]

    # W conv + its BN:  (cat(t1,t2) @ ww + wb) * s + b
    wwf = p["ww"] * p["wbn_s"][None, :]                            # (512, 256)
    wbf = p["wb"] * p["wbn_s"] + p["wbn_b"]                        # (256,)
    ww_sum = wwf[:C_OUT] + wwf[C_OUT:]                             # (256, 256)
    wwf_heads = jnp.stack([wwf[:C_OUT], wwf[C_OUT:]], axis=0)      # (2, 256, 256)

    # out = t @ (ww_sum + I) + per-batch offset, with t = x @ W_stem + b_stem:
    w2 = jnp.dot(w_stem, ww_sum, precision=hp) + w_stem            # (64, 256)
    bias_const = jnp.dot(b_stem, ww_sum, precision=hp) + b_stem + wbf

    # Attention score weights folded onto x (lane-dense (2,64)); the constant
    # score terms (conv bias, b_stem.cw) cancel inside the softmax.
    cw = jnp.stack([p["a1_cw"], p["a2_cw"]], axis=0)               # (2, 256)
    sx = jnp.dot(cw, w_stem.T, precision=hp)                       # (2, 64)

    t1w = jnp.stack([p["a1_t1w"], p["a2_t1w"]], axis=0)            # (2, 256, 256)
    t2w = jnp.stack([p["a1_t2w"], p["a2_t2w"]], axis=0)            # (2, 256, 256)

    vec = jnp.zeros((K_VEC, C_OUT), jnp.float32)
    vec = vec.at[_R_BSTEM].set(b_stem)
    vec = vec.at[_R_T1B + 0].set(p["a1_t1b"]).at[_R_T1B + 1].set(p["a2_t1b"])
    vec = vec.at[_R_LNW + 0].set(p["a1_lnw"]).at[_R_LNW + 1].set(p["a2_lnw"])
    vec = vec.at[_R_LNB + 0].set(p["a1_lnb"]).at[_R_LNB + 1].set(p["a2_lnb"])
    vec = vec.at[_R_T2B + 0].set(p["a1_t2b"]).at[_R_T2B + 1].set(p["a2_t2b"])
    vec = vec.at[_R_BCONST].set(bias_const)

    return (sx.astype(matmul_dtype), w_stem.astype(jnp.float32),
            t1w.astype(jnp.float32), t2w.astype(jnp.float32),
            wwf_heads.astype(jnp.float32), vec.astype(jnp.float32),
            w2.astype(matmul_dtype))


@functools.partial(jax.jit, static_argnames=("matmul_dtype", "out_dtype",
                                             "block_hw", "channels_last"))
def pixelnet_re(x, params, *, matmul_dtype=jnp.bfloat16, out_dtype=None,
                block_hw=None, channels_last=False):
    if out_dtype is None:
        out_dtype = matmul_dtype

    if channels_last:
        B, H, W, C = x.shape
        x_flat = x.reshape(B, H * W, C)
    else:
        B, C, H, W = x.shape
        # NCHW -> (B, HW, C): channels on the lane axis.  Avoidable entirely
        # with channels_last=True if the consumer accepts NHWC.
        x_flat = jnp.transpose(x, (0, 2, 3, 1)).reshape(B, H * W, C)
    assert C == C_IN
    HW = H * W

    tile = _pick_block_hw(HW, block_hw)
    hw_pad = ((HW + tile - 1) // tile) * tile
    n_hw = hw_pad // tile
    needs_mask = hw_pad != HW

    x_flat = x_flat.astype(matmul_dtype)
    if needs_mask:
        x_flat = jnp.pad(x_flat, ((0, 0), (0, hw_pad - HW), (0, 0)))

    (sx, w_stem, t1w, t2w, wwf_heads, vec, w2) = _fold_params(params, matmul_dtype)
    approx = matmul_dtype != jnp.float32

    def _const2(shape):
        return pl.BlockSpec(shape, lambda b, j: (0,) * len(shape))

    def _const1(shape):
        return pl.BlockSpec(shape, lambda b: (0,) * len(shape))

    # ---- pass 1: partial softmax stats, parallel over (B, HW tiles) ----
    part_acc, part_ml = pl.pallas_call(
        functools.partial(_stats_kernel, tile=tile, hw=HW, mask=needs_mask),
        out_shape=(jax.ShapeDtypeStruct((B, n_hw, N_HEADS, C_IN), jnp.float32),
                   jax.ShapeDtypeStruct((B, n_hw, N_HEADS, 2), jnp.float32)),
        grid=(B, n_hw),
        in_specs=[pl.BlockSpec((1, tile, C_IN), lambda b, j: (b, j, 0)),
                  _const2(sx.shape)],
        out_specs=(pl.BlockSpec((1, 1, N_HEADS, C_IN), lambda b, j: (b, j, 0, 0)),
                   pl.BlockSpec((1, 1, N_HEADS, 2), lambda b, j: (b, j, 0, 0))),
        compiler_params=pltpu.CompilerParams(
            dimension_semantics=("parallel", "parallel")),
    )(x_flat, sx)

    # ---- finalize: merge stats + run both AttentionBlock transformers ----
    bias_b = pl.pallas_call(
        functools.partial(_finalize_kernel, approx=approx),
        out_shape=jax.ShapeDtypeStruct((B, 1, C_OUT), jnp.float32),
        grid=(B,),
        in_specs=[pl.BlockSpec((1, n_hw, N_HEADS, C_IN), lambda b: (b, 0, 0, 0)),
                  pl.BlockSpec((1, n_hw, N_HEADS, 2), lambda b: (b, 0, 0, 0)),
                  _const1(w_stem.shape), _const1(t1w.shape),
                  _const1(t2w.shape), _const1(wwf_heads.shape),
                  _const1(vec.shape)],
        out_specs=pl.BlockSpec((1, 1, C_OUT), lambda b: (b, 0, 0)),
        compiler_params=pltpu.CompilerParams(
            dimension_semantics=("parallel",)),
    )(part_acc, part_ml, w_stem, t1w, t2w, wwf_heads, vec)

    # ---- pass 2: out = x @ W2 + bias_b (fully parallel, no t round-trip) ----
    out = pl.pallas_call(
        _out_kernel,
        out_shape=jax.ShapeDtypeStruct((B, hw_pad, C_OUT), out_dtype),
        grid=(B, n_hw),
        in_specs=[pl.BlockSpec((1, tile, C_IN), lambda b, j: (b, j, 0)),
                  _const2(w2.shape),
                  pl.BlockSpec((1, 1, C_OUT), lambda b, j: (b, 0, 0))],
        out_specs=pl.BlockSpec((1, tile, C_OUT), lambda b, j: (b, j, 0)),
        compiler_params=pltpu.CompilerParams(
            dimension_semantics=("parallel", "parallel")),
    )(x_flat, w2, bias_b)

    if needs_mask:
        out = out[:, :HW]
    if channels_last:
        return out.reshape(B, H, W, C_OUT)
    return jnp.transpose(out.reshape(B, H, W, C_OUT), (0, 3, 1, 2))  # -> NCHW


# --------------------------------------------------------------------------
# Deterministic parameters + pure-JAX reference (mirrors the PyTorch forward).
# --------------------------------------------------------------------------
def make_params(key, *, honor_constant_init=True):
    """honor_constant_init=True matches the module's __init__ constants
    (transformer[-1] and W's BatchNorm affine zero-initialised).  Setting it
    to False uses random values so the W-conv / transformer[-1] paths are
    actually exercised by the correctness check."""
    ki = iter(jax.random.split(key, 32))

    def rn(shape, scale=0.05):
        return scale * jax.random.normal(next(ki), shape, dtype=jnp.float32)

    bn_id = jnp.float32((1.0 + EPS_BN) ** -0.5)  # fresh eval BN: mean=0, var=1
    p = {}
    p["w1"] = rn((C_IN, C_MID))                  # conv weights stored (C_in, C_out)
    p["w3"] = rn((C_MID, C_OUT))
    if honor_constant_init:
        p["bn1_s"] = jnp.full((C_MID,), bn_id); p["bn1_b"] = jnp.zeros((C_MID,))
        p["bn3_s"] = jnp.full((C_OUT,), bn_id); p["bn3_b"] = jnp.zeros((C_OUT,))
    else:
        p["bn1_s"] = 1.0 + rn((C_MID,), 0.2); p["bn1_b"] = rn((C_MID,), 0.1)
        p["bn3_s"] = 1.0 + rn((C_OUT,), 0.2); p["bn3_b"] = rn((C_OUT,), 0.1)
    for i in (1, 2):
        p[f"a{i}_cw"] = rn((C_OUT,))
        p[f"a{i}_cb"] = rn(())
        p[f"a{i}_t1w"] = rn((C_OUT, C_OUT))
        p[f"a{i}_t1b"] = rn((C_OUT,), 0.2)
        if honor_constant_init:
            p[f"a{i}_lnw"] = jnp.ones((C_OUT,)); p[f"a{i}_lnb"] = jnp.zeros((C_OUT,))
            p[f"a{i}_t2w"] = jnp.zeros((C_OUT, C_OUT)); p[f"a{i}_t2b"] = jnp.zeros((C_OUT,))
        else:
            p[f"a{i}_lnw"] = 1.0 + rn((C_OUT,), 0.2); p[f"a{i}_lnb"] = rn((C_OUT,), 0.1)
            p[f"a{i}_t2w"] = rn((C_OUT, C_OUT)); p[f"a{i}_t2b"] = rn((C_OUT,))
    p["ww"] = rn((2 * C_OUT, C_OUT))
    p["wb"] = rn((C_OUT,))
    if honor_constant_init:
        p["wbn_s"] = jnp.zeros((C_OUT,)); p["wbn_b"] = jnp.zeros((C_OUT,))
    else:
        p["wbn_s"] = 1.0 + rn((C_OUT,), 0.2); p["wbn_b"] = rn((C_OUT,), 0.1)
    return p


def ref_forward_nchw(x_nchw, p):
    """Pure-JAX reference mirroring the PyTorch forward (eval-mode BN)."""
    hp = lax.Precision.HIGHEST
    B, C, H, W = x_nchw.shape
    HW = H * W
    x = jnp.transpose(x_nchw, (0, 2, 3, 1)).reshape(B, HW, C).astype(jnp.float32)
    h = jnp.einsum("bnc,cd->bnd", x, p["w1"], precision=hp) * p["bn1_s"] + p["bn1_b"]
    t = jnp.einsum("bnc,cd->bnd", h, p["w3"], precision=hp) * p["bn3_s"] + p["bn3_b"]

    def att(i):
        scores = jnp.einsum("bnc,c->bn", t, p[f"a{i}_cw"], precision=hp) + p[f"a{i}_cb"]
        attn = jax.nn.softmax(scores, axis=1)[..., None]                 # (B, HW, 1)
        feature = jnp.sum(attn * t, axis=1, keepdims=True)               # (B, 1, 256)
        f = jnp.einsum("bnc,cd->bnd", feature, p[f"a{i}_t1w"], precision=hp) + p[f"a{i}_t1b"]
        mu = jnp.mean(f, -1, keepdims=True)
        var = jnp.mean((f - mu) ** 2, -1, keepdims=True)
        f = (f - mu) / jnp.sqrt(var + EPS_LN)
        f = jnp.maximum(f * p[f"a{i}_lnw"] + p[f"a{i}_lnb"], 0.0)
        fg = jnp.einsum("bnc,cd->bnd", f, p[f"a{i}_t2w"], precision=hp) + p[f"a{i}_t2b"]
        return t + fg

    t1, t2 = att(1), att(2)
    tc = jnp.einsum("bnc,cd->bnd", jnp.concatenate([t1, t2], -1), p["ww"],
                    precision=hp) + p["wb"]
    tc = tc * p["wbn_s"] + p["wbn_b"]
    out = tc + t
    return jnp.transpose(out.reshape(B, H, W, C_OUT), (0, 3, 1, 2))


if __name__ == "__main__":
    key = jax.random.PRNGKey(0)
    kx, kp = jax.random.split(key)
    B, H, W = 2, 8, 8
    x = jax.random.normal(kx, (B, C_IN, H, W), dtype=jnp.float32)  # NCHW like torch

    # Random (non-degenerate) params so the W-conv and transformer[-1] paths
    # are actually exercised (the module's zero-inits would hide them).
    p = make_params(kp, honor_constant_init=False)
    ref = ref_forward_nchw(x, p)

    # 1) f32 validation mode, multi-tile HW grid (4 tiles of 16), f32 output.
    out_f32 = jax.block_until_ready(
        pixelnet_re(x, p, matmul_dtype=jnp.float32, block_hw=16))
    assert out_f32.shape == (B, C_OUT, H, W), out_f32.shape
    err32 = float(jnp.max(jnp.abs(out_f32 - ref)))
    assert err32 < 1e-2, f"f32 kernel mismatch: {err32}"

    # 2) Default production path: bf16 MXU operands + bf16 output, auto tiling.
    out_bf16 = jax.block_until_ready(pixelnet_re(x, p))
    errbf = float(jnp.max(jnp.abs(out_bf16.astype(jnp.float32) - ref)))
    assert errbf < 5e-2, f"bf16 kernel mismatch: {errbf}"

    # 3) channels_last fast path (no wrapper NCHW<->NHWC transposes).
    x_nhwc = jnp.transpose(x, (0, 2, 3, 1))
    out_cl = jax.block_until_ready(pixelnet_re(x_nhwc, p, channels_last=True))
    errcl = float(jnp.max(jnp.abs(
        jnp.transpose(out_cl, (0, 3, 1, 2)).astype(jnp.float32) - ref)))
    assert errcl < 5e-2, f"channels_last kernel mismatch: {errcl}"

    # 4) HW not a multiple of 8 (pad + -inf mask path), multi-tile, f32 check.
    Bb, Hb, Wb = 1, 9, 9
    xb = jax.random.normal(jax.random.PRNGKey(1), (Bb, C_IN, Hb, Wb),
                           dtype=jnp.float32)
    refb = ref_forward_nchw(xb, p)
    outb = jax.block_until_ready(
        pixelnet_re(xb, p, matmul_dtype=jnp.float32, block_hw=16))
    errb = float(jnp.max(jnp.abs(outb - refb)))
    assert errb < 1e-2, f"pad/mask kernel mismatch: {errb}"

    # 5) Module-faithful constant init (W BN and transformer[-1] zero-init).
    p0 = make_params(kp, honor_constant_init=True)
    out0 = jax.block_until_ready(pixelnet_re(x, p0))
    err0 = float(jnp.max(jnp.abs(out0.astype(jnp.float32) - ref_forward_nchw(x, p0))))
    assert err0 < 5e-2, f"default-init kernel mismatch: {err0}"

    print("KERNEL_OK")
</pallas_src>

<mosaic_0001>
module attributes {stable_mosaic.version = 11 : i64} {
  func.func @_stats_kernel(%arg0: i32, %arg1: i32, %arg2: memref<1x16x64xf32, #tpu.memory_space<vmem>>, %arg3: memref<2x64xf32, #tpu.memory_space<vmem>>, %arg4: memref<1x1x2x64xf32, #tpu.memory_space<vmem>>, %arg5: memref<1x1x2x2xf32, #tpu.memory_space<vmem>>) attributes {dimension_semantics = [#tpu.dimension_semantics<parallel>, #tpu.dimension_semantics<parallel>], iteration_bounds = array<i64: 2, 4>, scalar_prefetch = 0 : i64, scratch_operands = 0 : i64, tpu.core_type = #tpu.core_type<tc>, window_params = [{transform_indices = @transform_0, window_bounds = array<i64: 1, 16, 64>}, {pipeline_mode = #tpu.pipeline_mode<synchronous>, transform_indices = @transform_1, window_bounds = array<i64: 2, 64>}, {transform_indices = @transform_2, window_bounds = array<i64: 1, 1, 2, 64>}, {transform_indices = @transform_3, window_bounds = array<i64: 1, 1, 2, 2>}]} {
    %c0 = arith.constant 0 : index
    %c0_0 = arith.constant 0 : index
    %c0_1 = arith.constant 0 : index
    %0 = vector.load %arg2[%c0, %c0_0, %c0_1] : memref<1x16x64xf32, #tpu.memory_space<vmem>>, vector<1x16x64xf32>
    %1 = vector.shape_cast %0 : vector<1x16x64xf32> to vector<16x64xf32>
    %c0_2 = arith.constant 0 : index
    %c0_3 = arith.constant 0 : index
    %2 = vector.load %arg3[%c0_2, %c0_3] : memref<2x64xf32, #tpu.memory_space<vmem>>, vector<2x64xf32>
    %cst = arith.constant dense<0.000000e+00> : vector<2x16xf32>
    %3 = tpu.matmul %2, %1, %cst {dimension_numbers = #tpu.dot_dimension_numbers<[1], [1], [0], [0], [0, 0, 1, 0], [], []>} : vector<2x64xf32>, vector<16x64xf32>, vector<2x16xf32> -> vector<2x16xf32>
    %cst_4 = arith.constant dense<0xFF800000> : vector<2xf32>
    %4 = vector.multi_reduction <maximumf>, %3, %cst_4 [1] : vector<2x16xf32> to vector<2xf32>
    %5 = vector.shape_cast %4 : vector<2xf32> to vector<2x1xf32>
    %6 = vector.broadcast %5 : vector<2x1xf32> to vector<2x16xf32>
    %7 = arith.subf %3, %6 : vector<2x16xf32>
    %8 = math.exp %7 : vector<2x16xf32>
    %cst_5 = arith.constant dense<0.000000e+00> : vector<2xf32>
    %9 = vector.multi_reduction <add>, %8, %cst_5 [1] : vector<2x16xf32> to vector<2xf32>
    %10 = vector.shape_cast %9 : vector<2xf32> to vector<2x1xf32>
    %cst_6 = arith.constant dense<0.000000e+00> : vector<2x64xf32>
    %11 = tpu.matmul %8, %1, %cst_6 {dimension_numbers = #tpu.dot_dimension_numbers<[1], [0], [0], [1], [0, 0, 1, 1], [], []>} : vector<2x16xf32>, vector<16x64xf32>, vector<2x64xf32> -> vector<2x64xf32>
    %c0_7 = arith.constant 0 : index
    %c0_8 = arith.constant 0 : index
    %c0_9 = arith.constant 0 : index
    %c0_10 = arith.constant 0 : index
    %12 = vector.load %arg4[%c0_7, %c0_8, %c0_9, %c0_10] : memref<1x1x2x64xf32, #tpu.memory_space<vmem>>, vector<1x1x2x64xf32>
    %13 = vector.shape_cast %12 : vector<1x1x2x64xf32> to vector<2x64xf32>
    %14 = vector.shape_cast %11 : vector<2x64xf32> to vector<1x1x2x64xf32>
    tpu.vector_store %arg4[%c0_7, %c0_8, %c0_9, %c0_10], %14 {strides = array<i32>} : memref<1x1x2x64xf32, #tpu.memory_space<vmem>>, vector<1x1x2x64xf32>,
    %15 = tpu.concatenate %5, %10 in 1 : vector<2x1xf32>, vector<2x1xf32> -> vector<2x2xf32>
    %c0_11 = arith.constant 0 : index
    %c0_12 = arith.constant 0 : index
    %c0_13 = arith.constant 0 : index
    %c0_14 = arith.constant 0 : index
    %16 = vector.load %arg5[%c0_11, %c0_12, %c0_13, %c0_14] : memref<1x1x2x2xf32, #tpu.memory_space<vmem>>, vector<1x1x2x2xf32>
    %17 = vector.shape_cast %16 : vector<1x1x2x2xf32> to vector<2x2xf32>
    %18 = vector.shape_cast %15 : vector<2x2xf32> to vector<1x1x2x2xf32>
    tpu.vector_store %arg5[%c0_11, %c0_12, %c0_13, %c0_14], %18 {strides = array<i32>} : memref<1x1x2x2xf32, #tpu.memory_space<vmem>>, vector<1x1x2x2xf32>,
    return
  }
  func.func @transform_0(%arg0: i32, %arg1: i32) -> (i32, i32, i32) {
    %c0_i32 = arith.constant 0 : i32
    %c0_i32_0 = arith.constant 0 : i32
    return %arg0, %arg1, %c0_i32 : i32, i32, i32
  }
  func.func @transform_1(%arg0: i32, %arg1: i32) -> (i32, i32) {
    %c0_i32 = arith.constant 0 : i32
    %c0_i32_0 = arith.constant 0 : i32
    %c0_i32_1 = arith.constant 0 : i32
    return %c0_i32, %c0_i32_0 : i32, i32
  }
  func.func @transform_2(%arg0: i32, %arg1: i32) -> (i32, i32, i32, i32) {
    %c0_i32 = arith.constant 0 : i32
    %c0_i32_0 = arith.constant 0 : i32
    %c0_i32_1 = arith.constant 0 : i32
    return %arg0, %arg1, %c0_i32, %c0_i32_0 : i32, i32, i32, i32
  }
  func.func @transform_3(%arg0: i32, %arg1: i32) -> (i32, i32, i32, i32) {
    %c0_i32 = arith.constant 0 : i32
    %c0_i32_0 = arith.constant 0 : i32
    %c0_i32_1 = arith.constant 0 : i32
    return %arg0, %arg1, %c0_i32, %c0_i32_0 : i32, i32, i32, i32
  }
}

module attributes {stable_mosaic.version = 11 : i64} {
  func.func @_finalize_kernel(%arg0: i32, %arg1: memref<1x4x2x64xf32, #tpu.memory_space<vmem>>, %arg2: memref<1x4x2x2xf32, #tpu.memory_space<vmem>>, %arg3: memref<64x256xf32, #tpu.memory_space<vmem>>, %arg4: memref<2x256x256xf32, #tpu.memory_space<vmem>>, %arg5: memref<2x256x256xf32, #tpu.memory_space<vmem>>, %arg6: memref<2x256x256xf32, #tpu.memory_space<vmem>>, %arg7: memref<10x256xf32, #tpu.memory_space<vmem>>, %arg8: memref<1x1x256xf32, #tpu.memory_space<vmem>>) attributes {dimension_semantics = [#tpu.dimension_semantics<parallel>], iteration_bounds = array<i64: 2>, scalar_prefetch = 0 : i64, scratch_operands = 0 : i64, tpu.core_type = #tpu.core_type<tc>, window_params = [{transform_indices = @transform_0, window_bounds = array<i64: 1, 4, 2, 64>}, {transform_indices = @transform_1, window_bounds = array<i64: 1, 4, 2, 2>}, {pipeline_mode = #tpu.pipeline_mode<synchronous>, transform_indices = @transform_2, window_bounds = array<i64: 64, 256>}, {pipeline_mode = #tpu.pipeline_mode<synchronous>, transform_indices = @transform_3, window_bounds = array<i64: 2, 256, 256>}, {pipeline_mode = #tpu.pipeline_mode<synchronous>, transform_indices = @transform_4, window_bounds = array<i64: 2, 256, 256>}, {pipeline_mode = #tpu.pipeline_mode<synchronous>, transform_indices = @transform_5, window_bounds = array<i64: 2, 256, 256>}, {pipeline_mode = #tpu.pipeline_mode<synchronous>, transform_indices = @transform_6, window_bounds = array<i64: 10, 256>}, {transform_indices = @transform_7, window_bounds = array<i64: 1, 1, 256>}]} {
    %c0 = arith.constant 0 : index
    %c0_0 = arith.constant 0 : index
    %c0_1 = arith.constant 0 : index
    %c0_2 = arith.constant 0 : index
    %0 = vector.load %arg2[%c0, %c0_0, %c0_1, %c0_2] : memref<1x4x2x2xf32, #tpu.memory_space<vmem>>, vector<1x4x2x2xf32>
    %1 = vector.shape_cast %0 : vector<1x4x2x2xf32> to vector<4x2x2xf32>
    %2 = vector.extract_strided_slice %1 {offsets = [0, 0, 0], sizes = [4, 2, 1], strides = [1, 1, 1]} : vector<4x2x2xf32> to vector<4x2x1xf32>
    %3 = vector.extract_strided_slice %1 {offsets = [0, 0, 1], sizes = [4, 2, 1], strides = [1, 1, 1]} : vector<4x2x2xf32> to vector<4x2x1xf32>
    %cst = arith.constant dense<0xFF800000> : vector<2x1xf32>
    %4 = vector.multi_reduction <maximumf>, %2, %cst [0] : vector<4x2x1xf32> to vector<2x1xf32>
    %5 = vector.shape_cast %4 : vector<2x1xf32> to vector<1x2x1xf32>
    %6 = vector.broadcast %5 : vector<1x2x1xf32> to vector<4x2x1xf32>
    %7 = arith.subf %2, %6 : vector<4x2x1xf32>
    %8 = math.exp %7 : vector<4x2x1xf32>
    %9 = arith.mulf %8, %3 : vector<4x2x1xf32>
    %cst_3 = arith.constant dense<0.000000e+00> : vector<2x1xf32>
    %10 = vector.multi_reduction <add>, %9, %cst_3 [0] : vector<4x2x1xf32> to vector<2x1xf32>
    %c0_4 = arith.constant 0 : index
    %c0_5 = arith.constant 0 : index
    %c0_6 = arith.constant 0 : index
    %c0_7 = arith.constant 0 : index
    %11 = vector.load %arg1[%c0_4, %c0_5, %c0_6, %c0_7] : memref<1x4x2x64xf32, #tpu.memory_space<vmem>>, vector<1x4x2x64xf32>
    %12 = vector.shape_cast %11 : vector<1x4x2x64xf32> to vector<4x2x64xf32>
    %13 = vector.broadcast %8 : vector<4x2x1xf32> to vector<4x2x64xf32>
    %14 = arith.mulf %12, %13 : vector<4x2x64xf32>
    %cst_8 = arith.constant dense<0.000000e+00> : vector<2x64xf32>
    %15 = vector.multi_reduction <add>, %14, %cst_8 [0] : vector<4x2x64xf32> to vector<2x64xf32>
    %c0_9 = arith.constant 0 : index
    %c0_10 = arith.constant 0 : index
    %16 = vector.load %arg7[%c0_9, %c0_10] : memref<10x256xf32, #tpu.memory_space<vmem>>, vector<10x256xf32>
    %17 = vector.extract_strided_slice %10 {offsets = [0, 0], sizes = [1, 1], strides = [1, 1]} : vector<2x1xf32> to vector<1x1xf32>
    %18 = tpu.reciprocal %17 : vector<1x1xf32> -> vector<1x1xf32>
    %19 = vector.extract_strided_slice %15 {offsets = [0, 0], sizes = [1, 64], strides = [1, 1]} : vector<2x64xf32> to vector<1x64xf32>
    %20 = vector.broadcast %18 : vector<1x1xf32> to vector<1x64xf32>
    %21 = arith.mulf %19, %20 : vector<1x64xf32>
    %c0_11 = arith.constant 0 : index
    %c0_12 = arith.constant 0 : index
    %22 = vector.load %arg3[%c0_11, %c0_12] : memref<64x256xf32, #tpu.memory_space<vmem>>, vector<64x256xf32>
    %cst_13 = arith.constant dense<0.000000e+00> : vector<1x256xf32>
    %23 = tpu.matmul %21, %22, %cst_13 {dimension_numbers = #tpu.dot_dimension_numbers<[1], [0], [0], [1], [0, 0, 1, 1], [], []>} : vector<1x64xf32>, vector<64x256xf32>, vector<1x256xf32> -> vector<1x256xf32>
    %24 = vector.extract_strided_slice %16 {offsets = [0, 0], sizes = [1, 256], strides = [1, 1]} : vector<10x256xf32> to vector<1x256xf32>
    %25 = arith.addf %23, %24 : vector<1x256xf32>
    %c0_14 = arith.constant 0 : index
    %c0_15 = arith.constant 0 : index
    %c0_16 = arith.constant 0 : index
    %26 = vector.load %arg4[%c0_14, %c0_15, %c0_16] : memref<2x256x256xf32, #tpu.memory_space<vmem>>, vector<1x256x256xf32>
    %27 = vector.shape_cast %26 : vector<1x256x256xf32> to vector<256x256xf32>
    %cst_17 = arith.constant dense<0.000000e+00> : vector<1x256xf32>
    %28 = tpu.matmul %25, %27, %cst_17 {dimension_numbers = #tpu.dot_dimension_numbers<[1], [0], [0], [1], [0, 0, 1, 1], [], []>} : vector<1x256xf32>, vector<256x256xf32>, vector<1x256xf32> -> vector<1x256xf32>
    %29 = vector.extract_strided_slice %16 {offsets = [1, 0], sizes = [1, 256], strides = [1, 1]} : vector<10x256xf32> to vector<1x256xf32>
    %30 = arith.addf %28, %29 : vector<1x256xf32>
    %cst_18 = arith.constant dense<0.000000e+00> : vector<1xf32>
    %31 = vector.multi_reduction <add>, %30, %cst_18 [1] : vector<1x256xf32> to vector<1xf32>
    %32 = vector.shape_cast %31 : vector<1xf32> to vector<1x1xf32>
    %cst_19 = arith.constant 2.560000e+02 : f32
    %33 = vector.broadcast %cst_19 : f32 to vector<1x1xf32>
    %34 = arith.divf %32, %33 : vector<1x1xf32>
    %35 = vector.broadcast %34 : vector<1x1xf32> to vector<1x256xf32>
    %36 = arith.subf %30, %35 : vector<1x256xf32>
    %37 = arith.mulf %36, %36 : vector<1x256xf32>
    %cst_20 = arith.constant dense<0.000000e+00> : vector<1xf32>
    %38 = vector.multi_reduction <add>, %37, %cst_20 [1] : vector<1x256xf32> to vector<1xf32>
    %39 = vector.shape_cast %38 : vector<1xf32> to vector<1x1xf32>
    %cst_21 = arith.constant 2.560000e+02 : f32
    %40 = vector.broadcast %cst_21 : f32 to vector<1x1xf32>
    %41 = arith.divf %39, %40 : vector<1x1xf32>
    %42 = vector.broadcast %34 : vector<1x1xf32> to vector<1x256xf32>
    %43 = arith.subf %30, %42 : vector<1x256xf32>
    %cst_22 = arith.constant 9.99999974E-6 : f32
    %44 = vector.broadcast %cst_22 : f32 to vector<1x1xf32>
    %45 = arith.addf %41, %44 : vector<1x1xf32>
    %46 = math.rsqrt %45 : vector<1x1xf32>
    %47 = vector.broadcast %46 : vector<1x1xf32> to vector<1x256xf32>
    %48 = arith.mulf %43, %47 : vector<1x256xf32>
    %49 = vector.extract_strided_slice %16 {offsets = [3, 0], sizes = [1, 256], strides = [1, 1]} : vector<10x256xf32> to vector<1x256xf32>
    %50 = arith.mulf %48, %49 : vector<1x256xf32>
    %51 = vector.extract_strided_slice %16 {offsets = [5, 0], sizes = [1, 256], strides = [1, 1]} : vector<10x256xf32> to vector<1x256xf32>
    %52 = arith.addf %50, %51 : vector<1x256xf32>
    %cst_23 = arith.constant 0.000000e+00 : f32
    %53 = vector.broadcast %cst_23 : f32 to vector<1x256xf32>
    %54 = arith.maximumf %52, %53 : vector<1x256xf32>
    %c0_24 = arith.constant 0 : index
    %c0_25 = arith.constant 0 : index
    %c0_26 = arith.constant 0 : index
    %55 = vector.load %arg5[%c0_24, %c0_25, %c0_26] : memref<2x256x256xf32, #tpu.memory_space<vmem>>, vector<1x256x256xf32>
    %56 = vector.shape_cast %55 : vector<1x256x256xf32> to vector<256x256xf32>
    %cst_27 = arith.constant dense<0.000000e+00> : vector<1x256xf32>
    %57 = tpu.matmul %54, %56, %cst_27 {dimension_numbers = #tpu.dot_dimension_numbers<[1], [0], [0], [1], [0, 0, 1, 1], [], []>} : vector<1x256xf32>, vector<256x256xf32>, vector<1x256xf32> -> vector<1x256xf32>
    %58 = vector.extract_strided_slice %16 {offsets = [7, 0], sizes = [1, 256], strides = [1, 1]} : vector<10x256xf32> to vector<1x256xf32>
    %59 = arith.addf %57, %58 : vector<1x256xf32>
    %c0_28 = arith.constant 0 : index
    %c0_29 = arith.constant 0 : index
    %c0_30 = arith.constant 0 : index
    %60 = vector.load %arg6[%c0_28, %c0_29, %c0_30] : memref<2x256x256xf32, #tpu.memory_space<vmem>>, vector<1x256x256xf32>
    %61 = vector.shape_cast %60 : vector<1x256x256xf32> to vector<256x256xf32>
    %cst_31 = arith.constant dense<0.000000e+00> : vector<1x256xf32>
    %62 = tpu.matmul %59, %61, %cst_31 {dimension_numbers = #tpu.dot_dimension_numbers<[1], [0], [0], [1], [0, 0, 1, 1], [], []>} : vector<1x256xf32>, vector<256x256xf32>, vector<1x256xf32> -> vector<1x256xf32>
    %63 = vector.extract_strided_slice %10 {offsets = [1, 0], sizes = [1, 1], strides = [1, 1]} : vector<2x1xf32> to vector<1x1xf32>
    %64 = tpu.reciprocal %63 : vector<1x1xf32> -> vector<1x1xf32>
    %65 = vector.extract_strided_slice %15 {offsets = [1, 0], sizes = [1, 64], strides = [1, 1]} : vector<2x64xf32> to vector<1x64xf32>
    %66 = vector.broadcast %64 : vector<1x1xf32> to vector<1x64xf32>
    %67 = arith.mulf %65, %66 : vector<1x64xf32>
    %c0_32 = arith.constant 0 : index
    %c0_33 = arith.constant 0 : index
    %68 = vector.load %arg3[%c0_32, %c0_33] : memref<64x256xf32, #tpu.memory_space<vmem>>, vector<64x256xf32>
    %cst_34 = arith.constant dense<0.000000e+00> : vector<1x256xf32>
    %69 = tpu.matmul %67, %68, %cst_34 {dimension_numbers = #tpu.dot_dimension_numbers<[1], [0], [0], [1], [0, 0, 1, 1], [], []>} : vector<1x64xf32>, vector<64x256xf32>, vector<1x256xf32> -> vector<1x256xf32>
    %70 = vector.extract_strided_slice %16 {offsets = [0, 0], sizes = [1, 256], strides = [1, 1]} : vector<10x256xf32> to vector<1x256xf32>
    %71 = arith.addf %69, %70 : vector<1x256xf32>
    %c1 = arith.constant 1 : index
    %c0_35 = arith.constant 0 : index
    %c0_36 = arith.constant 0 : index
    %72 = vector.load %arg4[%c1, %c0_35, %c0_36] : memref<2x256x256xf32, #tpu.memory_space<vmem>>, vector<1x256x256xf32>
    %73 = vector.shape_cast %72 : vector<1x256x256xf32> to vector<256x256xf32>
    %cst_37 = arith.constant dense<0.000000e+00> : vector<1x256xf32>
    %74 = tpu.matmul %71, %73, %cst_37 {dimension_numbers = #tpu.dot_dimension_numbers<[1], [0], [0], [1], [0, 0, 1, 1], [], []>} : vector<1x256xf32>, vector<256x256xf32>, vector<1x256xf32> -> vector<1x256xf32>
    %75 = vector.extract_strided_slice %16 {offsets = [2, 0], sizes = [1, 256], strides = [1, 1]} : vector<10x256xf32> to vector<1x256xf32>
    %76 = arith.addf %74, %75 : vector<1x256xf32>
    %cst_38 = arith.constant dense<0.000000e+00> : vector<1xf32>
    %77 = vector.multi_reduction <add>, %76, %cst_38 [1] : vector<1x256xf32> to vector<1xf32>
    %78 = vector.shape_cast %77 : vector<1xf32> to vector<1x1xf32>
    %cst_39 = arith.constant 2.560000e+02 : f32
    %79 = vector.broadcast %cst_39 : f32 to vector<1x1xf32>
    %80 = arith.divf %78, %79 : vector<1x1xf32>
    %81 = vector.broadcast %80 : vector<1x1xf32> to vector<1x256xf32>
    %82 = arith.subf %76, %81 : vector<1x256xf32>
    %83 = arith.mulf %82, %82 : vector<1x256xf32>
    %cst_40 = arith.constant dense<0.000000e+00> : vector<1xf32>
    %84 = vector.multi_reduction <add>, %83, %cst_40 [1] : vector<1x256xf32> to vector<1xf32>
    %85 = vector.shape_cast %84 : vector<1xf32> to vector<1x1xf32>
    %cst_41 = arith.constant 2.560000e+02 : f32
    %86 = vector.broadcast %cst_41 : f32 to vector<1x1xf32>
    %87 = arith.divf %85, %86 : vector<1x1xf32>
    %88 = vector.broadcast %80 : vector<1x1xf32> to vector<1x256xf32>
    %89 = arith.subf %76, %88 : vector<1x256xf32>
    %cst_42 = arith.constant 9.99999974E-6 : f32
    %90 = vector.broadcast %cst_42 : f32 to vector<1x1xf32>
    %91 = arith.addf %87, %90 : vector<1x1xf32>
    %92 = math.rsqrt %91 : vector<1x1xf32>
    %93 = vector.broadcast %92 : vector<1x1xf32> to vector<1x256xf32>
    %94 = arith.mulf %89, %93 : vector<1x256xf32>
    %95 = vector.extract_strided_slice %16 {offsets = [4, 0], sizes = [1, 256], strides = [1, 1]} : vector<10x256xf32> to vector<1x256xf32>
    %96 = arith.mulf %94, %95 : vector<1x256xf32>
    %97 = vector.extract_strided_slice %16 {offsets = [6, 0], sizes = [1, 256], strides = [1, 1]} : vector<10x256xf32> to vector<1x256xf32>
    %98 = arith.addf %96, %97 : vector<1x256xf32>
    %cst_43 = arith.constant 0.000000e+00 : f32
    %99 = vector.broadcast %cst_43 : f32 to vector<1x256xf32>
    %100 = arith.maximumf %98, %99 : vector<1x256xf32>
    %c1_44 = arith.constant 1 : index
    %c0_45 = arith.constant 0 : index
    %c0_46 = arith.constant 0 : index
    %101 = vector.load %arg5[%c1_44, %c0_45, %c0_46] : memref<2x256x256xf32, #tpu.memory_space<vmem>>, vector<1x256x256xf32>
    %102 = vector.shape_cast %101 : vector<1x256x256xf32> to vector<256x256xf32>
    %cst_47 = arith.constant dense<0.000000e+00> : vector<1x256xf32>
    %103 = tpu.matmul %100, %102, %cst_47 {dimension_numbers = #tpu.dot_dimension_numbers<[1], [0], [0], [1], [0, 0, 1, 1], [], []>} : vector<1x256xf32>, vector<256x256xf32>, vector<1x256xf32> -> vector<1x256xf32>
    %104 = vector.extract_strided_slice %16 {offsets = [8, 0], sizes = [1, 256], strides = [1, 1]} : vector<10x256xf32> to vector<1x256xf32>
    %105 = arith.addf %103, %104 : vector<1x256xf32>
    %c1_48 = arith.constant 1 : index
    %c0_49 = arith.constant 0 : index
    %c0_50 = arith.constant 0 : index
    %106 = vector.load %arg6[%c1_48, %c0_49, %c0_50] : memref<2x256x256xf32, #tpu.memory_space<vmem>>, vector<1x256x256xf32>
    %107 = vector.shape_cast %106 : vector<1x256x256xf32> to vector<256x256xf32>
    %cst_51 = arith.constant dense<0.000000e+00> : vector<1x256xf32>
    %108 = tpu.matmul %105, %107, %cst_51 {dimension_numbers = #tpu.dot_dimension_numbers<[1], [0], [0], [1], [0, 0, 1, 1], [], []>} : vector<1x256xf32>, vector<256x256xf32>, vector<1x256xf32> -> vector<1x256xf32>
    %109 = arith.addf %62, %108 : vector<1x256xf32>
    %110 = vector.extract_strided_slice %16 {offsets = [9, 0], sizes = [1, 256], strides = [1, 1]} : vector<10x256xf32> to vector<1x256xf32>
    %111 = arith.addf %109, %110 : vector<1x256xf32>
    %c0_52 = arith.constant 0 : index
    %c0_53 = arith.constant 0 : index
    %c0_54 = arith.constant 0 : index
    %112 = vector.load %arg8[%c0_52, %c0_53, %c0_54] : memref<1x1x256xf32, #tpu.memory_space<vmem>>, vector<1x1x256xf32>
    %113 = vector.shape_cast %112 : vector<1x1x256xf32> to vector<1x256xf32>
    %114 = vector.shape_cast %111 : vector<1x256xf32> to vector<1x1x256xf32>
    tpu.vector_store %arg8[%c0_52, %c0_53, %c0_54], %114 {strides = array<i32>} : memref<1x1x256xf32, #tpu.memory_space<vmem>>, vector<1x1x256xf32>,
    return
  }
  func.func @transform_0(%arg0: i32) -> (i32, i32, i32, i32) {
    %c0_i32 = arith.constant 0 : i32
    %c0_i32_0 = arith.constant 0 : i32
    %c0_i32_1 = arith.constant 0 : i32
    %c0_i32_2 = arith.constant 0 : i32
    return %arg0, %c0_i32, %c0_i32_0, %c0_i32_1 : i32, i32, i32, i32
  }
  func.func @transform_1(%arg0: i32) -> (i32, i32, i32, i32) {
    %c0_i32 = arith.constant 0 : i32
    %c0_i32_0 = arith.constant 0 : i32
    %c0_i32_1 = arith.constant 0 : i32
    %c0_i32_2 = arith.constant 0 : i32
    return %arg0, %c0_i32, %c0_i32_0, %c0_i32_1 : i32, i32, i32, i32
  }
  func.func @transform_2(%arg0: i32) -> (i32, i32) {
    %c0_i32 = arith.constant 0 : i32
    %c0_i32_0 = arith.constant 0 : i32
    %c0_i32_1 = arith.constant 0 : i32
    return %c0_i32, %c0_i32_0 : i32, i32
  }
  func.func @transform_3(%arg0: i32) -> (i32, i32, i32) {
    %c0_i32 = arith.constant 0 : i32
    %c0_i32_0 = arith.constant 0 : i32
    %c0_i32_1 = arith.constant 0 : i32
    %c0_i32_2 = arith.constant 0 : i32
    return %c0_i32, %c0_i32_0, %c0_i32_1 : i32, i32, i32
  }
  func.func @transform_4(%arg0: i32) -> (i32, i32, i32) {
    %c0_i32 = arith.constant 0 : i32
    %c0_i32_0 = arith.constant 0 : i32
    %c0_i32_1 = arith.constant 0 : i32
    %c0_i32_2 = arith.constant 0 : i32
    return %c0_i32, %c0_i32_0, %c0_i32_1 : i32, i32, i32
  }
  func.func @transform_5(%arg0: i32) -> (i32, i32, i32) {
    %c0_i32 = arith.constant 0 : i32
    %c0_i32_0 = arith.constant 0 : i32
    %c0_i32_1 = arith.constant 0 : i32
    %c0_i32_2 = arith.constant 0 : i32
    return %c0_i32, %c0_i32_0, %c0_i32_1 : i32, i32, i32
  }
  func.func @transform_6(%arg0: i32) -> (i32, i32) {
    %c0_i32 = arith.constant 0 : i32
    %c0_i32_0 = arith.constant 0 : i32
    %c0_i32_1 = arith.constant 0 : i32
    return %c0_i32, %c0_i32_0 : i32, i32
  }
  func.func @transform_7(%arg0: i32) -> (i32, i32, i32) {
    %c0_i32 = arith.constant 0 : i32
    %c0_i32_0 = arith.constant 0 : i32
    %c0_i32_1 = arith.constant 0 : i32
    return %arg0, %c0_i32, %c0_i32_0 : i32, i32, i32
  }
}

module attributes {stable_mosaic.version = 11 : i64} {
  func.func @_out_kernel(%arg0: i32, %arg1: i32, %arg2: memref<1x16x64xf32, #tpu.memory_space<vmem>>, %arg3: memref<64x256xf32, #tpu.memory_space<vmem>>, %arg4: memref<1x1x256xf32, #tpu.memory_space<vmem>>, %arg5: memref<1x16x256xf32, #tpu.memory_space<vmem>>) attributes {dimension_semantics = [#tpu.dimension_semantics<parallel>, #tpu.dimension_semantics<parallel>], iteration_bounds = array<i64: 2, 4>, scalar_prefetch = 0 : i64, scratch_operands = 0 : i64, tpu.core_type = #tpu.core_type<tc>, window_params = [{transform_indices = @transform_0, window_bounds = array<i64: 1, 16, 64>}, {pipeline_mode = #tpu.pipeline_mode<synchronous>, transform_indices = @transform_1, window_bounds = array<i64: 64, 256>}, {transform_indices = @transform_2, window_bounds = array<i64: 1, 1, 256>}, {transform_indices = @transform_3, window_bounds = array<i64: 1, 16, 256>}]} {
    %c0 = arith.constant 0 : index
    %c0_0 = arith.constant 0 : index
    %c0_1 = arith.constant 0 : index
    %0 = vector.load %arg2[%c0, %c0_0, %c0_1] : memref<1x16x64xf32, #tpu.memory_space<vmem>>, vector<1x16x64xf32>
    %1 = vector.shape_cast %0 : vector<1x16x64xf32> to vector<16x64xf32>
    %c0_2 = arith.constant 0 : index
    %c0_3 = arith.constant 0 : index
    %2 = vector.load %arg3[%c0_2, %c0_3] : memref<64x256xf32, #tpu.memory_space<vmem>>, vector<64x256xf32>
    %cst = arith.constant dense<0.000000e+00> : vector<16x256xf32>
    %3 = tpu.matmul %1, %2, %cst {dimension_numbers = #tpu.dot_dimension_numbers<[1], [0], [0], [1], [0, 0, 1, 1], [], []>} : vector<16x64xf32>, vector<64x256xf32>, vector<16x256xf32> -> vector<16x256xf32>
    %c0_4 = arith.constant 0 : index
    %c0_5 = arith.constant 0 : index
    %c0_6 = arith.constant 0 : index
    %4 = vector.load %arg4[%c0_4, %c0_5, %c0_6] : memref<1x1x256xf32, #tpu.memory_space<vmem>>, vector<1x1x256xf32>
    %5 = vector.shape_cast %4 : vector<1x1x256xf32> to vector<1x256xf32>
    %6 = vector.broadcast %5 : vector<1x256xf32> to vector<16x256xf32>
    %7 = arith.addf %3, %6 : vector<16x256xf32>
    %c0_7 = arith.constant 0 : index
    %c0_8 = arith.constant 0 : index
    %c0_9 = arith.constant 0 : index
    %8 = vector.load %arg5[%c0_7, %c0_8, %c0_9] : memref<1x16x256xf32, #tpu.memory_space<vmem>>, vector<1x16x256xf32>
    %9 = vector.shape_cast %8 : vector<1x16x256xf32> to vector<16x256xf32>
    %10 = vector.shape_cast %7 : vector<16x256xf32> to vector<1x16x256xf32>
    tpu.vector_store %arg5[%c0_7, %c0_8, %c0_9], %10 {strides = array<i32>} : memref<1x16x256xf32, #tpu.memory_space<vmem>>, vector<1x16x256xf32>,
    return
  }
  func.func @transform_0(%arg0: i32, %arg1: i32) -> (i32, i32, i32) {
    %c0_i32 = arith.constant 0 : i32
    %c0_i32_0 = arith.constant 0 : i32
    return %arg0, %arg1, %c0_i32 : i32, i32, i32
  }
  func.func @transform_1(%arg0: i32, %arg1: i32) -> (i32, i32) {
    %c0_i32 = arith.constant 0 : i32
    %c0_i32_0 = arith.constant 0 : i32
    %c0_i32_1 = arith.constant 0 : i32
    return %c0_i32, %c0_i32_0 : i32, i32
  }
  func.func @transform_2(%arg0: i32, %arg1: i32) -> (i32, i32, i32) {
    %c0_i32 = arith.constant 0 : i32
    %c0_i32_0 = arith.constant 0 : i32
    %c0_i32_1 = arith.constant 0 : i32
    return %arg0, %c0_i32, %c0_i32_0 : i32, i32, i32
  }
  func.func @transform_3(%arg0: i32, %arg1: i32) -> (i32, i32, i32) {
    %c0_i32 = arith.constant 0 : i32
    %c0_i32_0 = arith.constant 0 : i32
    return %arg0, %arg1, %c0_i32 : i32, i32, i32
  }
}

</mosaic_0001>

<bundles_post_ra>
// kernel: pixelnet_re.3
= control target key start
LH: loop header
LB: loop body
LE: loop exit
PB: predicated region body
PF: predicated region fallthrough
CT: control target
= control target key end

     0   :  { %s678_s12 = smov 0   ;;  %s680_s13 = smov 0   ;;  %s744_s0 = inlined_call_operand.vmem [shape: f32[2,64,64], index: 0, kind: input, shape index: {}]   ;;  %s745_s1 = inlined_call_operand.vmem [shape: f32[2,64], index: 1, kind: input, shape index: {}]   ;;  %s746_s2 = inlined_call_operand.vmem [shape: f32[2,4,2,64], index: 2, kind: output, shape index: {0}]   ;;  %s747_s3 = inlined_call_operand.vmem [shape: f32[2,4,2,2], index: 3, kind: output, shape index: {1}]  }
   0x1   :  { %s682_s14 = smov 0   ;;  %s684_s15 = smov 0  }
   0x2   :  { %s686_s16 = smov 0  }
   0x3 LB: > { %s23_s17 = sadd.s32 1, %s646_s14  ;;  %s26_s18 = sadd.s32 1, %s650_s15  ;;  %s654_s16 = sphi %s686_s16, %s14_s16   ;;  %s650_s15 = sphi %s684_s15, %s751_s15   ;;  %s646_s14 = sphi %s682_s14, %s750_s14   ;;  %s642_s13 = sphi %s680_s13, %s749_s13   ;;  %s638_s12 = sphi %s678_s12, %s748_s12  }
   0x4   : > { %p24_p0 = scmp.ge.s32.totalorder %s23_s17, 4  ;;  %p538_p1 = scmp.ge.s32.totalorder %s654_s16, 1 }
   0x5   : > { %p163_p2 = scmp.lt.s32.totalorder %s654_s16, 9 }
   0x6   : > { %s753_s17 = smov (%p24_p0, %s23_s17), 0  ;;  %s755_s18 = smov (!%p24_p0, %s26_s18), %s650_s15 }
   0x7   : > { %p164_p3 = pnand %p538_p1, %p163_p2  ;;  %p28_p4 = scmp.ge.s32.totalorder %s755_s18, 2 }
   0x8   : > { %s539_s19 = sshll.u32 (!%p164_p3), %s638_s12, 1  ;;  %p203_p5 = scmp.lt.s32.totalorder (!%p164_p3), %s642_s13, 1 }
   0x9   : > { %s757_s18 = smov (%p28_p4, %s755_s18), 0  ;;  %167 = sbr.rel (%p164_p3) target bundleno = 572 (0x23c), region = 28 }
   0xa   : > { %p205_p6 = scmp.lt.s32.totalorder (!%p164_p3), %s539_s19, 7  ;;  %p214_p7 = scmp.lt.s32.totalorder (!%p164_p3), %s638_s12, 3 }
   0xe   : > { %v656_v0 = vmov 0.0   ;;  %vm657_vm0 = vmmov 0   ;;  %s759_s13 = smov (!%p203_p5, %s642_s13), 1  ;;  %s761_s19 = smov (!%p205_p6, %s539_s19), 7  ;;  %vm231_vm1 = vcmask 523264   ;;  %vm311_vm2 = vcmask 123904  }
   0xf   : > { %558 = vmatprep.subr.mxu0 %v656_v0  ;;  %562 = vmatprep.mubr.msk.f32.mxu0 %vm657_vm0, %v656_v0  ;;  %s540_s20 = sshll.u32 %s759_s13, 3  ;;  %v230_v3 = vld [vmem:[%s745_s1] sm:$0x3]  ;;  %vm321_vm3 = vcmask 130048   ;;  %s763_s12 = smov (!%p214_p7, %s638_s12), 3  ;;  %vm397_vm4 = vcmask 7168  }
  0x10   : > { %565 = vmatprep.subr.mxu1 %v656_v0  ;;  %569 = vmatprep.mubr.msk.f32.mxu1 %vm657_vm0, %v656_v0  ;;  %s208_s21 = sadd.s32 %s540_s20, %s761_s19  ;;  %s542_s28 = sshll.u32 %s759_s13, 2  ;;  %vm399_vm5 = vcmask 9216   ;;  %vm395_vm6 = vcmask 517120  }
  0x11   : > { %s541_s22 = sshll.u32 %s208_s21, 3  ;;  %s217_s29 = sadd.s32 %s542_s28, %s763_s12 }
  0x12   : > { %s210_s25 = scalar_lea.vmem %s744_s0, %s541_s22  ;;  %s543_s30 = sshll.u32 %s217_s29, 1 }
  0x13   : > { %v229_v1 = vld [vmem:[%s210_s25 + $0x8] sm:$0xff]  ;;  %v228_v2 = vld [vmem:[%s210_s25] sm:$0xff]  ;;  %s227_s6 = scalar_lea.vmem %s747_s3, %s543_s30  ;;  %s219_s9 = scalar_lea.vmem %s746_s2, %s543_s30 }
  0x14   : > { %559 = vmatpush3.xpose.msk.msra.mxu0 %vm231_vm1, %v229_v1  ;;  %566 = vmatpush3.msra.mxu1 %v229_v1 }
  0x15   : > { %560 = vmatprep.subr.mxu0 %v656_v0  ;;  %567 = vmatprep.subr.mxu1 %v656_v0 }
  0x16   : > { %568 = vmatpush3.msra.mxu1 %v228_v2 }
  0x18   : > { %561 = vmatpush3.xpose.msk.msra.mxu0 %vm231_vm1, %v228_v2 }
  0x1b   : > { %563 = vmatmul.mubr.msk.f32.vlgmr.msra.gmra.mxu0 %vm231_vm1, %v230_v3 }
  0xdb   : > { %v307_v4 = vpop.f32.mrf.mxu0 }
  0xdc   : > { %v312_v5 = vsel %vm311_vm2, %v307_v4, -inf }
  0xdd   : > { %313 = vmax.xlane.f32.xlu0 %v312_v5  ;;  %v564_v6 = vpop.f32.mrf.mxu0 }
 0x166   : > { %v314_v7 = vpop.xlane.xlu0 %313 }
 0x167   : > { %v315_v8 = vsub.f32 %v307_v4, %v314_v7 }
 0x169   : > { %v316_v9 = vmul.f32 1.442695, %v315_v8 }
 0x16b   : > { %614 = vpow2.f32 %v316_v9 }
 0x178   : > { %v615_v10 = vpop.eup %614 }
 0x179   : > { %570 = vmatmul.mubr.msk.f32.vlgmr.msra.gmra.mxu1 %vm321_vm3, %v615_v10  ;;  %v318_v11 = vsel %vm311_vm2, %v615_v10, 0.0 }
 0x17a   : > { %319 = vadd.xlane.f32.xlu0 %v318_v11 }
 0x203   : > { %v320_v12 = vpop.xlane.xlu0 %319 }
 0x204   : > { %v398_v13 = vsel %vm397_vm4, %v314_v7, %v320_v12 }
 0x205   : > { %400 = vst.msk [vmem:[%s227_s6] sm:$0x3] %vm399_vm5, %v398_v13 }
 0x239   : > { %v391_v14 = vpop.f32.mrf.mxu1 }
 0x23a   : > { %396 = vst.msk [vmem:[%s219_s9] sm:$0x3] %vm395_vm6, %v391_v14 }
 0x23b   : > { %v571_v15 = vpop.f32.mrf.mxu1 }
 0x23c PF: > { %s14_s16 = sadd.s32 1, %s654_s16   ;;  %s748_s12 = smov %s646_s14 }
 0x23d   : > { %p11_p8 = scmp.ge.s32.totalorder %s14_s16, 10   ;;  %s749_s13 = smov %s650_s15 }
 0x23e   : > { %s750_s14 = smov %s753_s17  ;;  %s751_s15 = smov %s757_s18 }
 0x23f   :  { %13 = sbr.rel (!%p11_p8) target bundleno = 3 (0x3), region = 70 }

// kernel: pixelnet_re.5
= control target key start
LH: loop header
LB: loop body
LE: loop exit
PB: predicated region body
PF: predicated region fallthrough
CT: control target
= control target key end

     0   :  { %8 = vsyncpa [#allocation3], 0  ;;  %s867_s0 = inlined_call_operand.vmem [shape: f32[2,64,64], index: 0, kind: input, shape index: {}]   ;;  %s868_s1 = inlined_call_operand.vmem [shape: f32[64,256], index: 1, kind: input, shape index: {}]   ;;  %s869_s2 = inlined_call_operand.vmem [shape: f32[2,1,256], index: 2, kind: input, shape index: {}]   ;;  %s870_s3 = inlined_call_operand.hbm [shape: f32[2,64,256], index: 3, kind: output, shape index: {}]  }
   0x1   :  { %10 = vsyncpa [#allocation3 + $0x1], 0  ;;  %s674_s12 = smov 0   ;;  %s676_s13 = smov 0  }
   0x2   :  { %s678_s14 = smov 0   ;;  %s680_s15 = smov 0  }
   0x3   :  { %s682_s16 = smov 0   ;;  %s684_s17 = smov 0  }
   0x4   :  { %s686_s18 = smov 0   ;;  %s688_s19 = smov 0  }
   0x5 LB: > { %s446_s20 = sadd.s32 4294967295, %s648_s19   ;;  %s447_s21 = sadd.s32 4294967294, %s648_s19   ;;  %s648_s19 = sphi %s688_s19, %s16_s19   ;;  %s644_s18 = sphi %s686_s18, %s879_s18   ;;  %s640_s17 = sphi %s684_s17, %s878_s17   ;;  %s636_s16 = sphi %s682_s16, %s877_s16   ;;  %s632_s15 = sphi %s680_s15, %s876_s15   ;;  %s628_s14 = sphi %s678_s14, %s875_s14   ;;  %s624_s13 = sphi %s676_s13, %s874_s13   ;;  %s620_s12 = sphi %s674_s12, %s873_s12  }
   0x6   : > { %s25_s22 = sadd.s32 1, %s640_s17  ;;  %s28_s23 = sadd.s32 1, %s644_s18 }
   0x7   : > { %p26_p0 = scmp.ge.s32.totalorder %s25_s22, 4  ;;  %p122_p1 = scmp.ne.s32.totalorder %s628_s14, %s624_s13 }
   0x8   : > { %p123_p2 = scmp.eq.s32.totalorder %s446_s20, 7  ;;  %p128_p5 = scmp.ne.s32.totalorder %s624_s13, %s620_s12 }
   0x9   : > { %s881_s22 = smov (%p26_p0, %s25_s22), 0  ;;  %s883_s23 = smov (!%p26_p0, %s28_s23), %s644_s18 }
   0xa   : > { %s108_s24 = ssub.s32 %s640_s17, %s881_s22  ;;  %p725_p3 = por %p123_p2, %p122_p1 }
   0xb   : > { %p30_p4 = scmp.ge.s32.totalorder %s883_s23, 2  ;;  %p129_p6 = scmp.eq.s32.totalorder %s447_s21, 7 }
   0xc   : > { %p450_p7 = scmp.ge.s32.totalorder %s648_s19, 1  ;;  %p170_p9 = scmp.lt.s32.totalorder %s648_s19, 9 }
   0xd   : > { %s885_s23 = smov (%p30_p4, %s883_s23), 0  ;;  %p734_p8 = por %p129_p6, %p128_p5 }
   0xe   : > { %s107_s27 = ssub.s32 %s644_s18, %s885_s23  ;;  %s112_s28 = sadd.s32 1, %s628_s14 }
   0xf   : > { %s109_s29 = sor.u32 %s108_s24, %s107_s27  ;;  %p171_p10 = pnand %p450_p7, %p170_p9 }
  0x10   : > { %p110_p11 = scmp.eq.s32.totalorder %s109_s29, 0  ;;  %s452_s10 = sshll.u32 (!%p171_p10), %s632_s15, 1 }
  0x11   : > { %174 = sbr.rel (%p171_p10) target bundleno = 251 (0xfb), region = 32  ;;  %p203_p12 = scmp.lt.s32.totalorder (!%p171_p10), %s636_s16, 1 }
  0x12   : > { %s743_s30 = scalar_select %p110_p11, %s628_s14, %s112_s28  }
  0x13   : > { %p205_p13 = scmp.lt.s32.totalorder (!%p171_p10), %s452_s10, 7  ;;  %s465_s11 = sshll.u32 (!%p171_p10), %s632_s15, 2 }
  0x14   : > { %s461_s21 = sshll.u32 (!%p171_p10), %s636_s16, 4 }
  0x15   : > { %s349_s24 = sadd.s32 (!%p171_p10), %s465_s11, %s461_s21 }
  0x16   : > { %v234_v0 = vld [vmem:[%s868_s1 + $0x78] sm:$0xff]  ;;  %v233_v1 = vld [vmem:[%s868_s1 + $0x70] sm:$0xff]  ;;  %v232_v2 = vld [vmem:[%s868_s1 + $0x68] sm:$0xff]  ;;  %s763_s27 = scalar_select %p203_p12, %s636_s16, 1  ;;  %vm247_vm0 = vcmask 523264   ;;  %v650_v18 = vmov 0.0   ;;  %v237_v19 = vlaneseq }
  0x17   : > { %270 = vmatprep.subr.mxu0 %v234_v0  ;;  %466 = vmatprep.subr.mxu1 %v234_v0  ;;  %v231_v3 = vld [vmem:[%s868_s1 + $0x60] sm:$0xff]  ;;  %v230_v4 = vld [vmem:[%s868_s1 + $0x58] sm:$0xff]  ;;  %v229_v5 = vld [vmem:[%s868_s1 + $0x50] sm:$0xff]  ;;  %s887_s10 = smov (!%p205_p13, %s452_s10), 7 }
  0x18   : > { %271 = vmatpush1.msra.mxu0 %v233_v1  ;;  %474 = vmatpush1.msra.mxu1 %v233_v1  ;;  %v228_v6 = vld [vmem:[%s868_s1 + $0x48] sm:$0xff]  ;;  %s453_s6 = sshll.u32 %s763_s27, 3  ;;  %v227_v7 = vld [vmem:[%s868_s1 + $0x40] sm:$0xff]  ;;  %v226_v8 = vld [vmem:[%s868_s1 + $0x38] sm:$0xff]  ;;  %s455_s5 = sshll.u32 %s763_s27, 1  ;;  %v238_v20 = vshrl.u32 %v237_v19, 7 }
  0x19   : > { %272 = vmatprep.subr.mxu0 %v232_v2  ;;  %467 = vmatprep.subr.mxu1 %v232_v2  ;;  %s208_s20 = sadd.s32 %s453_s6, %s887_s10  ;;  %v225_v9 = vld [vmem:[%s868_s1 + $0x30] sm:$0xff]  ;;  %v224_v10 = vld [vmem:[%s868_s1 + $0x28] sm:$0xff]  ;;  %v223_v11 = vld [vmem:[%s868_s1 + $0x20] sm:$0xff]  ;;  %s215_s8 = scalar_lea.vmem %s869_s2, %s455_s5 }
  0x1a   : > { %273 = vmatpush1.msra.mxu0 %v231_v3  ;;  %475 = vmatpush1.msra.mxu1 %v231_v3  ;;  %s454_s7 = sshll.u32 %s208_s20, 3  ;;  %v222_v12 = vld [vmem:[%s868_s1 + $0x18] sm:$0xff]  ;;  %v221_v13 = vld [vmem:[%s868_s1 + $0x10] sm:$0xff]  ;;  %v220_v14 = vld [vmem:[%s868_s1 + $0x8] sm:$0xff]  ;;  %v239_v21 = vsub.s32 0, %v238_v20  ;;  %v243_v23 = vsub.s32 1, %v238_v20 }
  0x1b   : > { %274 = vmatprep.subr.mxu0 %v230_v4  ;;  %468 = vmatprep.subr.mxu1 %v230_v4  ;;  %s210_s28 = scalar_lea.vmem %s867_s0, %s454_s7  ;;  %v219_v15 = vld [vmem:[%s868_s1] sm:$0xff]  ;;  %s199_s7 = sand.u32 1, %s624_s13  }
  0x1c   : > { %275 = vmatpush1.msra.mxu0 %v229_v5  ;;  %476 = vmatpush1.msra.mxu1 %v229_v5  ;;  %v217_v16 = vld [vmem:[%s210_s28] sm:$0xff]  ;;  %v218_v17 = vld [vmem:[%s210_s28 + $0x8] sm:$0xff]  ;;  %s451_s9 = sshll.u32 %s199_s7, 5  ;;  %s462_s27 = sshll.u32 %s349_s24, 7 }
  0x1d   : > { %276 = vmatprep.subr.mxu0 %v228_v6  ;;  %469 = vmatprep.subr.mxu1 %v228_v6  ;;  %v235_v22 = vld [vmem:[%s215_s8] sm:$0x3]  ;;  %s201_s20 = scalar_lea.vmem [#allocation2], %s451_s9  ;;  %s814_s29 = scalar_lea.hbm %s870_s3, %s462_s27 }
  0x1e   : > { %277 = vmatpush1.msra.mxu0 %v227_v7  ;;  %477 = vmatpush1.msra.mxu1 %v227_v7  ;;  %v240_v24 = vrot.slane %v235_v22, %v239_v21  ;;  %s352_s28 = sshll.u32 %s201_s20, 4  ;;  %v244_v25 = vrot.slane %v235_v22, %v243_v23  ;;  %s816_s4 = scalar_lea.sflag [#allocation3], %s199_s7  ;;  %s809_s28 = int_to_ptr.vmem [resolvable:$true] %s352_s28 }
  0x1f   : > { %278 = vmatprep.subr.mxu0 %v226_v8  ;;  %470 = vmatprep.subr.mxu1 %v226_v8  ;;  %s556_s5 = scalar_lea.vmem %s809_s28, 512  ;;  %s651_s10 = smov [#allocation2]  }
  0x20   : > { %279 = vmatpush1.msra.mxu0 %v225_v9  ;;  %478 = vmatpush1.msra.mxu1 %v225_v9  ;;  %p557_p0 = scmp.ne.s32.totalorder %s809_s28, %s556_s5  ;;  %s560_s6 = sshll.u32 %s651_s10, 4  ;;  %s561_s6 = int_to_ptr.vmem [resolvable:$false] %s560_s6 }
  0x21   : > { %280 = vmatprep.subr.mxu0 %v224_v10  ;;  %471 = vmatprep.subr.mxu1 %v224_v10  ;;  %s562_s8 = scalar_lea.vmem %s561_s6, 1024  ;;  %p563_p4 = scmp.lt.s32.totalorder %s809_s28, %s561_s6 }
  0x22   : > { %281 = vmatpush1.msra.mxu0 %v223_v11  ;;  %479 = vmatpush1.msra.mxu1 %v223_v11  ;;  %p558_p1 = pnand %p557_p0, %p725_p3  ;;  %p564_p5 = scmp.lt.s32.totalorder %s562_s8, %s556_s5 }
  0x23   : > { %282 = vmatprep.subr.mxu0 %v222_v12  ;;  %472 = vmatprep.subr.mxu1 %v222_v12 }
  0x24   : > { %283 = vmatpush1.msra.mxu0 %v221_v13  ;;  %480 = vmatpush1.msra.mxu1 %v221_v13  ;;  %p559_p2 = pneg %p558_p1  ;;  %p565_p6 = por %p564_p5, %p563_p4 }
  0x25   : > { %284 = vmatprep.subr.mxu0 %v220_v14  ;;  %473 = vmatprep.subr.mxu1 %v220_v14 }
  0x26   : > { %285 = vmatpush1.msra.mxu0 %v219_v15  ;;  %481 = vmatpush1.msra.mxu1 %v219_v15  ;;  %p566_p7 = pnand %p565_p6, %p559_p2 }
  0x27   : > { %318 = vmatprep.mubr.f32.mxu0 %v650_v18  ;;  %324 = vmatprep.mubr.f32.mxu1 %v650_v18 }
  0x28   : > { %456 = vmatmul.mubr.msk.f32.vlgmr.msra.gmra.mxu0 %vm247_vm0, %v217_v16  ;;  %457 = vmatmul.mubr.msk.f32.vlgmr.msra.gmra.mxu1 %vm247_vm0, %v218_v17 }
  0xe8   : > { %v320_v26 = vpop.f32.mrf.mxu0  ;;  %v326_v27 = vpop.f32.mrf.mxu1 }
  0xe9   : > { %v321_v28 = vadd.f32 %v320_v26, %v240_v24  ;;  %v327_v29 = vadd.f32 %v326_v27, %v240_v24 }
  0xea   : > { %v322_v30 = vpop.f32.mrf.mxu0  ;;  %v328_v31 = vpop.f32.mrf.mxu1 }
  0xeb   : > { %331 = vst [vmem:[%s201_s20] sm:$0xff] %v321_v28  ;;  %333 = vst [vmem:[%s201_s20 + $0x10] sm:$0xff] %v327_v29  ;;  %v323_v32 = vadd.f32 %v322_v30, %v244_v25  ;;  %v329_v33 = vadd.f32 %v328_v31, %v244_v25 }
  0xed   : > { %332 = vst [vmem:[%s201_s20 + $0x8] sm:$0xff] %v323_v32  ;;  %334 = vst [vmem:[%s201_s20 + $0x18] sm:$0xff] %v329_v33 }
  0xee   : > { %569 = shalt.err (!%p566_p7)
}
  0xef   : > { %s570_s7 = scalar_lea.hbm %s814_s29, 512  ;;  %s574_s21 = scalar_lea.hbm %s870_s3, 4096 }
  0xf0   : > { %p571_p9 = scmp.ne.s32.totalorder %s814_s29, %s570_s7  ;;  %p575_p12 = scmp.lt.s32.totalorder %s814_s29, %s870_s3 }
  0xf1   : > { %p576_p13 = scmp.lt.s32.totalorder %s574_s21, %s570_s7 }
  0xf2   : > { %p572_p10 = pnand %p571_p9, %p725_p3 }
  0xf3   : > { %p577_p0 = por %p576_p13, %p575_p12 }
  0xf4   : > { %p573_p11 = pneg %p572_p10 }
  0xf6   : > { %p578_p1 = pnand %p577_p0, %p573_p11 }
  0xf8   : > { %581 = shalt.err (!%p578_p1)
}
  0xf9   : > { %s652_s27 = smov 256   ;;  %s653_s15 = smov 16  }
  0xfa   : > { %482 = dma.vmem_to_hbm [thread:$0]  (%p725_p3), %s809_s28, 512, %s814_s29, %s816_s4, %s652_s27, %s652_s27, %s653_s15  }
  0xfb PF: > { %p488_p2 = scmp.ge.s32.totalorder %s648_s19, 2  ;;  %s367_s16 = sand.u32 1, %s620_s12  }
  0xfc   : > { %s368_s5 = scalar_lea.sflag [#allocation3], %s367_s16 }
  0xfd   : > { %p485_p4 = pnand %p488_p2, %p734_p8 }
  0xff   : > { %p486_p5 = pneg %p485_p4 }
 0x101   : > { %615 = dma.done.wait (%p486_p5), %s368_s5, 512  }
 0x102   : > { %617 = vsyncadd (%p486_p5), %s368_s5, 4294966784  ;;  %s16_s19 = sadd.s32 1, %s648_s19   ;;  %s873_s12 = smov %s624_s13 }
 0x103   : > { %p13_p6 = scmp.ge.s32.totalorder %s16_s19, 10   ;;  %s874_s13 = smov %s628_s14 }
 0x104   : > { %s875_s14 = smov %s743_s30  ;;  %s876_s15 = smov %s640_s17 }
 0x105   : > { %s877_s16 = smov %s644_s18  ;;  %s878_s17 = smov %s881_s22 }
 0x106   : > { %s879_s18 = smov %s885_s23  ;;  %15 = sbr.rel (!%p13_p6) target bundleno = 5 (0x5), region = 70 }
 0x10b   :  { %373 = vsyncpa [#allocation3], 1 }
 0x10c   :  { %375 = vsyncpa [#allocation3 + $0x1], 1 }

// kernel: pixelnet_re.4
= control target key start
LH: loop header
LB: loop body
LE: loop exit
PB: predicated region body
PF: predicated region fallthrough
CT: control target
= control target key end

     0   :  { %s1843_s24 = smov 0   ;;  %s3239_s0 = inlined_call_operand.vmem [shape: f32[2,4,2,64], index: 0, kind: input, shape index: {}]   ;;  %s3240_s1 = inlined_call_operand.vmem [shape: f32[2,4,2,2], index: 1, kind: input, shape index: {}]   ;;  %s3241_s2 = inlined_call_operand.vmem [shape: f32[64,256], index: 2, kind: input, shape index: {}]   ;;  %s3242_s3 = inlined_call_operand.vmem [shape: f32[2,256,256], index: 3, kind: input, shape index: {}]   ;;  %s3243_s4 = inlined_call_operand.vmem [shape: f32[2,256,256], index: 4, kind: input, shape index: {}]   ;;  %s3244_s5 = inlined_call_operand.vmem [shape: f32[2,256,256], index: 5, kind: input, shape index: {}]   ;;  %s3245_s6 = inlined_call_operand.vmem [shape: f32[10,256], index: 6, kind: input, shape index: {}]   ;;  %s3246_s7 = inlined_call_operand.vmem [shape: f32[2,1,256], index: 7, kind: output, shape index: {}]  }
   0x1 LB: > { %s1553_s25 = sadd.s32 4294967295, %s1797_s24   ;;  %p1557_p0 = scmp.ge.s32.totalorder %s1797_s24, 1  ;;  %s1797_s24 = sphi %s1843_s24, %s17_s24  }
   0x2   : > { %p247_p1 = scmp.lt.s32.totalorder %s1797_s24, 3 }
   0x4   : > { %p248_p2 = pnand %p1557_p0, %p247_p1 }
   0x5   : > { %p283_p3 = scmp.lt.s32.totalorder (!%p248_p2), %s1553_s25, 1  ;;  %s1800_s30 = smov (!%p248_p2), 127  }
   0x6   : > { %251 = sbr.rel (%p248_p2) target bundleno = 1973 (0x7b5), region = 48 }
   0xb   : > { %s3248_s25 = smov (!%p283_p3, %s1553_s25), 1  ;;  %vm301_vm0 = vcmask 1024   ;;  %v1799_v0 = vmov 0   ;;  %v1866_v21 = vld [vmem:[%s3241_s2 + $0x78] sm:$0xff]  ;;  %v1872_v23 = vld [vmem:[%s3241_s2 + $0x70] sm:$0xff]  ;;  %v1877_v24 = vld [vmem:[%s3241_s2 + $0x68] sm:$0xff] }
   0xc   : > { %s1759_s26 = sshll.u32 %s3248_s25, 3  ;;  %1774 = vset.pattern.permute.xlu1 %v1799_v0  ;;  %1773 = vset.pattern.permute.xlu0 %v1799_v0  ;;  %v1884_v27 = vld [vmem:[%s3241_s2 + $0x60] sm:$0xff]  ;;  %v1889_v28 = vld [vmem:[%s3241_s2 + $0x58] sm:$0xff]  ;;  %v1895_v29 = vld [vmem:[%s3241_s2 + $0x50] sm:$0xff]  ;;  %v1801_v55 = vmov 0.0   ;;  %vm376_vm1 = vcmask 517120  }
   0xd   : > { %s292_s29 = scalar_lea.vmem %s3240_s1, %s1759_s26  ;;  %431 = vmatprep.subr.mxu0 %v1866_v21  ;;  %v1900_v30 = vld [vmem:[%s3241_s2 + $0x48] sm:$0xff]  ;;  %v1906_v31 = vld [vmem:[%s3241_s2 + $0x40] sm:$0xff]  ;;  %v1912_v32 = vld [vmem:[%s3241_s2 + $0x38] sm:$0xff]  ;;  %479 = vmatprep.mubr.f32.mxu0 %v1801_v55  ;;  %s287_s20 = scalar_lea.vmem %s3239_s0, %s1759_s26  ;;  %vm411_vm2 = vcmask 523264   ;;  %vm627_vm3 = vcmask 1040384  }
   0xe   : > { %v297_v1 = vld [vmem:[%s292_s29] sm:$0x3]  ;;  %v299_v2 = vld [vmem:[%s292_s29 + $0x4] sm:$0x3]  ;;  %v298_v3 = vld [vmem:[%s292_s29 + $0x2] sm:$0x3]  ;;  %432 = vmatpush1.msra.mxu0 %v1872_v23 }
   0xf   : > { %325 = vrot.lane.b32.xlu0 %v297_v1, %s1800_s30  ;;  %v302_v4 = vsel %vm301_vm0, %v297_v1, -inf  ;;  %329 = vrot.lane.b32.xlu1 %v299_v2, %s1800_s30  ;;  %v304_v5 = vsel %vm301_vm0, %v299_v2, -inf  ;;  %v303_v6 = vsel %vm301_vm0, %v298_v3, -inf  ;;  %v300_v7 = vld [vmem:[%s292_s29 + $0x6] sm:$0x3]  ;;  %v1918_v33 = vld [vmem:[%s3241_s2 + $0x30] sm:$0xff] }
  0x10   : > { %v306_v8 = vmax.f32 %v302_v4, %v303_v6  ;;  %v305_v9 = vsel %vm301_vm0, %v300_v7, -inf  ;;  %433 = vmatprep.subr.mxu0 %v1877_v24  ;;  %v1924_v34 = vld [vmem:[%s3241_s2 + $0x28] sm:$0xff]  ;;  %v1930_v35 = vld [vmem:[%s3241_s2 + $0x20] sm:$0xff]  ;;  %v1936_v36 = vld [vmem:[%s3241_s2 + $0x18] sm:$0xff]  ;;  %s1562_s11 = sshll.u32 %s3248_s25, 1 }
  0x11   : > { %v307_v10 = vmax.f32 %v304_v5, %v305_v9  ;;  %434 = vmatpush1.msra.mxu0 %v1884_v27  ;;  %v1942_v37 = vld [vmem:[%s3241_s2 + $0x10] sm:$0xff]  ;;  %v1954_v53 = vld [vmem:[%s3241_s2 + $0x8] sm:$0xff]  ;;  %v1960_v54 = vld [vmem:[%s3241_s2] sm:$0xff]  ;;  %s296_s14 = scalar_lea.vmem %s3246_s7, %s1562_s11 }
  0x12   : > { %435 = vmatprep.subr.mxu0 %v1889_v28  ;;  %v517_v56 = vld [vmem:[%s3242_s3 + $0xf8] sm:$0xff]  ;;  %v516_v57 = vld [vmem:[%s3242_s3 + $0xf0] sm:$0xff]  ;;  %v515_v58 = vld [vmem:[%s3242_s3 + $0xe8] sm:$0xff] }
  0x13   : > { %327 = vrot.lane.b32.xlu0 %v298_v3, %s1800_s30  ;;  %331 = vrot.lane.b32.xlu1 %v300_v7, %s1800_s30  ;;  %v308_v11 = vmax.f32 %v306_v8, %v307_v10  ;;  %v514_v60 = vld [vmem:[%s3242_s3 + $0xe0] sm:$0xff]  ;;  %v513_v61 = vld [vmem:[%s3242_s3 + $0xd8] sm:$0xff] }
  0x14   : > { %436 = vmatpush1.msra.mxu0 %v1895_v29  ;;  %556 = vmatprep.subr.mxu1 %v517_v56  ;;  %v512_v62 = vld [vmem:[%s3242_s3 + $0xd0] sm:$0xff]  ;;  %v511_v63 = vld [vmem:[%s3242_s3 + $0xc8] sm:$0xff]  ;;  %v510_v0 = vld [vmem:[%s3242_s3 + $0xc0] sm:$0xff] }
  0x15   : > { %v309_v12 = vsub.f32 %v297_v1, %v308_v11  ;;  %v310_v13 = vsub.f32 %v298_v3, %v308_v11  ;;  %v312_v14 = vsub.f32 %v300_v7, %v308_v11  ;;  %v311_v16 = vsub.f32 %v299_v2, %v308_v11  ;;  %437 = vmatprep.subr.mxu0 %v1900_v30  ;;  %v509_v1 = vld [vmem:[%s3242_s3 + $0xb8] sm:$0xff]  ;;  %v508_v2 = vld [vmem:[%s3242_s3 + $0xb0] sm:$0xff]  ;;  %v507_v3 = vld [vmem:[%s3242_s3 + $0xa8] sm:$0xff] }
  0x16   : > { %438 = vmatpush1.msra.mxu0 %v1906_v31  ;;  %557 = vmatpush1.msra.mxu1 %v516_v57  ;;  %v506_v4 = vld [vmem:[%s3242_s3 + $0xa0] sm:$0xff]  ;;  %v505_v5 = vld [vmem:[%s3242_s3 + $0x98] sm:$0xff]  ;;  %v504_v6 = vld [vmem:[%s3242_s3 + $0x90] sm:$0xff] }
  0x17   : > { %v313_v15 = vmul.f32 1.442695, %v309_v12  ;;  %v315_v17 = vmul.f32 1.442695, %v310_v13  ;;  %v319_v18 = vmul.f32 1.442695, %v312_v14  ;;  %439 = vmatprep.subr.mxu0 %v1912_v32  ;;  %558 = vmatprep.subr.mxu1 %v515_v58 }
  0x18   : > { %v317_v19 = vmul.f32 1.442695, %v311_v16  ;;  %440 = vmatpush1.msra.mxu0 %v1918_v33  ;;  %559 = vmatpush1.msra.mxu1 %v514_v60  ;;  %v503_v7 = vld [vmem:[%s3242_s3 + $0x88] sm:$0xff]  ;;  %v502_v8 = vld [vmem:[%s3242_s3 + $0x80] sm:$0xff]  ;;  %v501_v9 = vld [vmem:[%s3242_s3 + $0x78] sm:$0xff] }
  0x19   : > { %1775 = vpow2.f32 %v313_v15  ;;  %441 = vmatprep.subr.mxu0 %v1924_v34  ;;  %560 = vmatprep.subr.mxu1 %v513_v61  ;;  %v500_v10 = vld [vmem:[%s3242_s3 + $0x70] sm:$0xff]  ;;  %v499_v11 = vld [vmem:[%s3242_s3 + $0x68] sm:$0xff]  ;;  %v498_v12 = vld [vmem:[%s3242_s3 + $0x60] sm:$0xff] }
  0x1a   : > { %1777 = vpow2.f32 %v315_v17  ;;  %442 = vmatpush1.msra.mxu0 %v1930_v35  ;;  %561 = vmatpush1.msra.mxu1 %v512_v62  ;;  %v497_v13 = vld [vmem:[%s3242_s3 + $0x58] sm:$0xff]  ;;  %v496_v14 = vld [vmem:[%s3242_s3 + $0x50] sm:$0xff]  ;;  %v495_v15 = vld [vmem:[%s3242_s3 + $0x48] sm:$0xff] }
  0x1b   : > { %1779 = vpow2.f32 %v319_v18  ;;  %443 = vmatprep.subr.mxu0 %v1936_v36  ;;  %562 = vmatprep.subr.mxu1 %v511_v63  ;;  %v494_v16 = vld [vmem:[%s3242_s3 + $0x40] sm:$0xff]  ;;  %v493_v17 = vld [vmem:[%s3242_s3 + $0x38] sm:$0xff]  ;;  %v492_v18 = vld [vmem:[%s3242_s3 + $0x30] sm:$0xff] }
  0x1c   : > { %1781 = vpow2.f32 %v317_v19  ;;  %444 = vmatpush1.msra.mxu0 %v1942_v37  ;;  %563 = vmatpush1.msra.mxu1 %v510_v0  ;;  %v491_v19 = vld [vmem:[%s3242_s3 + $0x28] sm:$0xff]  ;;  %v534_v57 = vld [vmem:[%s3242_s3 + $0x180] sm:$0xff]  ;;  %v533_v58 = vld [vmem:[%s3242_s3 + $0x178] sm:$0xff] }
  0x1d   : > { %445 = vmatprep.subr.mxu0 %v1954_v53  ;;  %564 = vmatprep.subr.mxu1 %v509_v1  ;;  %v535_v56 = vld [vmem:[%s3242_s3 + $0x188] sm:$0xff]  ;;  %v530_v61 = vld [vmem:[%s3242_s3 + $0x160] sm:$0xff]  ;;  %v529_v62 = vld [vmem:[%s3242_s3 + $0x158] sm:$0xff] }
  0x1e   : > { %446 = vmatpush1.msra.mxu0 %v1960_v54  ;;  %565 = vmatpush1.msra.mxu1 %v508_v2  ;;  %v531_v60 = vld [vmem:[%s3242_s3 + $0x168] sm:$0xff]  ;;  %v528_v63 = vld [vmem:[%s3242_s3 + $0x150] sm:$0xff]  ;;  %v526_v1 = vld [vmem:[%s3242_s3 + $0x140] sm:$0xff] }
  0x1f   : > { %566 = vmatprep.subr.mxu1 %v507_v3  ;;  %v527_v0 = vld [vmem:[%s3242_s3 + $0x148] sm:$0xff]  ;;  %v525_v2 = vld [vmem:[%s3242_s3 + $0x138] sm:$0xff]  ;;  %v524_v3 = vld [vmem:[%s3242_s3 + $0x130] sm:$0xff] }
  0x20   : > { %567 = vmatpush1.msra.mxu1 %v506_v4  ;;  %v523_v4 = vld [vmem:[%s3242_s3 + $0x128] sm:$0xff] }
  0x21   : > { %568 = vmatprep.subr.mxu1 %v505_v5 }
  0x22   : > { %569 = vmatpush1.msra.mxu1 %v504_v6  ;;  %v349_v6 = vld [vmem:[%s287_s20 + $0x2] sm:$0x3] }
  0x23   : > { %570 = vmatprep.subr.mxu1 %v503_v7 }
  0x24   : > { %571 = vmatpush1.msra.mxu1 %v502_v8  ;;  %v348_v8 = vld [vmem:[%s287_s20] sm:$0x3] }
  0x25   : > { %572 = vmatprep.subr.mxu1 %v501_v9 }
  0x26   : > { %v1776_v20 = vpop.eup %1775  ;;  %573 = vmatpush1.msra.mxu1 %v500_v10 }
  0x27   : > { %354 = vperm.xlu0 %1773, %v1776_v20   ;;  %v1778_v22 = vpop.eup %1777  ;;  %574 = vmatprep.subr.mxu1 %v499_v11 }
  0x28   : > { %359 = vperm.xlu1 %1774, %v1778_v22   ;;  %v1780_v25 = vpop.eup %1779  ;;  %575 = vmatpush1.msra.mxu1 %v498_v12  ;;  %v350_v12 = vld [vmem:[%s287_s20 + $0x4] sm:$0x3] }
  0x29   : > { %v1782_v26 = vpop.eup %1781  ;;  %576 = vmatprep.subr.mxu1 %v497_v13 }
  0x2a   : > { %577 = vmatpush1.msra.mxu1 %v496_v14 }
  0x2b   : > { %369 = vperm.xlu0 %1773, %v1780_v25   ;;  %578 = vmatprep.subr.mxu1 %v495_v15 }
  0x2c   : > { %364 = vperm.xlu1 %1774, %v1782_v26   ;;  %579 = vmatpush1.msra.mxu1 %v494_v16 }
  0x2d   : > { %580 = vmatprep.subr.mxu1 %v493_v17  ;;  %v351_v17 = vld [vmem:[%s287_s20 + $0x6] sm:$0x3] }
  0x2e   : > { %581 = vmatpush1.msra.mxu1 %v492_v18 }
  0x2f   : > { %582 = vmatprep.subr.mxu1 %v491_v19 }
  0x81   : > { %v326_v38 = vpop.permute.xlu0 %325  ;;  %v330_v39 = vpop.permute.xlu1 %329 }
  0x82   : > { %v337_v40 = vmul.f32 %v1776_v20, %v326_v38  ;;  %v339_v43 = vmul.f32 %v1782_v26, %v330_v39  ;;  %v490_v20 = vld [vmem:[%s3242_s3 + $0x20] sm:$0xff]  ;;  %v487_v26 = vld [vmem:[%s3242_s3 + $0x8] sm:$0xff]  ;;  %v549_v39 = vld [vmem:[%s3242_s3 + $0x1f8] sm:$0xff] }
  0x83   : > { %583 = vmatpush1.msra.mxu1 %v490_v20  ;;  %v486_v38 = vld [vmem:[%s3242_s3] sm:$0xff] }
  0x84   : > { %v341_v46 = vsel %vm301_vm0, %v337_v40, 0.0  ;;  %v344_v49 = vsel %vm301_vm0, %v339_v43, 0.0  ;;  %v548_v40 = vld [vmem:[%s3242_s3 + $0x1f0] sm:$0xff]  ;;  %v545_v43 = vld [vmem:[%s3242_s3 + $0x1d8] sm:$0xff] }
  0x85   : > { %v328_v41 = vpop.permute.xlu0 %327  ;;  %v332_v42 = vpop.permute.xlu1 %331 }
  0x86   : > { %v338_v44 = vmul.f32 %v1778_v22, %v328_v41  ;;  %v340_v45 = vmul.f32 %v1780_v25, %v332_v42  ;;  %v489_v22 = vld [vmem:[%s3242_s3 + $0x18] sm:$0xff]  ;;  %v488_v25 = vld [vmem:[%s3242_s3 + $0x10] sm:$0xff]  ;;  %v547_v41 = vld [vmem:[%s3242_s3 + $0x1e8] sm:$0xff] }
  0x87   : > { %584 = vmatprep.subr.mxu1 %v489_v22  ;;  %v546_v42 = vld [vmem:[%s3242_s3 + $0x1e0] sm:$0xff] }
  0x88   : > { %v342_v47 = vsel %vm301_vm0, %v338_v44, 0.0  ;;  %v346_v50 = vsel %vm301_vm0, %v340_v45, 0.0  ;;  %585 = vmatpush1.msra.mxu1 %v488_v25  ;;  %v544_v44 = vld [vmem:[%s3242_s3 + $0x1d0] sm:$0xff]  ;;  %v543_v45 = vld [vmem:[%s3242_s3 + $0x1c8] sm:$0xff] }
  0x89   : > { %v343_v48 = vadd.f32 %v342_v47, %v341_v46  ;;  %586 = vmatprep.subr.mxu1 %v487_v26  ;;  %v542_v46 = vld [vmem:[%s3242_s3 + $0x1c0] sm:$0xff]  ;;  %v541_v47 = vld [vmem:[%s3242_s3 + $0x1b8] sm:$0xff] }
  0x8a   : > { %587 = vmatpush1.msra.mxu1 %v486_v38 }
  0x8b   : > { %v345_v51 = vadd.f32 %v344_v49, %v343_v48  ;;  %588 = vmatprep.subr.mxu1 %v549_v39  ;;  %v540_v48 = vld [vmem:[%s3242_s3 + $0x1b0] sm:$0xff]  ;;  %v539_v49 = vld [vmem:[%s3242_s3 + $0x1a8] sm:$0xff] }
  0x8c   : > { %589 = vmatpush2.msra.mxu1 %v548_v40  ;;  %v522_v40 = vld [vmem:[%s3242_s3 + $0x120] sm:$0xff] }
  0x8d   : > { %v347_v52 = vadd.f32 %v346_v50, %v345_v51  ;;  %590 = vmatprep.subr.mxu1 %v547_v41  ;;  %v538_v50 = vld [vmem:[%s3242_s3 + $0x1a0] sm:$0xff]  ;;  %v537_v51 = vld [vmem:[%s3242_s3 + $0x198] sm:$0xff] }
  0x8e   : > { %591 = vmatpush2.msra.mxu1 %v546_v42  ;;  %v521_v41 = vld [vmem:[%s3242_s3 + $0x118] sm:$0xff]  ;;  %v520_v42 = vld [vmem:[%s3242_s3 + $0x110] sm:$0xff] }
  0x8f   : > { %1783 = vrcp.f32 %v347_v52  ;;  %592 = vmatprep.subr.mxu1 %v545_v43  ;;  %v536_v52 = vld [vmem:[%s3242_s3 + $0x190] sm:$0xff]  ;;  %v519_v43 = vld [vmem:[%s3242_s3 + $0x108] sm:$0xff] }
  0x90   : > { %593 = vmatpush2.msra.mxu1 %v544_v44  ;;  %v518_v44 = vld [vmem:[%s3242_s3 + $0x100] sm:$0xff] }
  0x91   : > { %594 = vmatprep.subr.mxu1 %v543_v45 }
  0x92   : > { %595 = vmatpush2.msra.mxu1 %v542_v46  ;;  %v2166_v46 = vld [vmem:[%s3245_s6 + $0x8] sm:$0xff] }
  0x93   : > { %596 = vmatprep.subr.mxu1 %v541_v47  ;;  %v2171_v47 = vld [vmem:[%s3245_s6] sm:$0xff] }
  0x94   : > { %597 = vmatpush2.msra.mxu1 %v540_v48 }
  0x95   : > { %598 = vmatprep.subr.mxu1 %v539_v49 }
  0x96   : > { %599 = vmatpush2.msra.mxu1 %v538_v50 }
  0x97   : > { %600 = vmatprep.subr.mxu1 %v537_v51  ;;  %v687_v51 = vld [vmem:[%s3243_s4 + $0xc0] sm:$0xff] }
  0x98   : > { %601 = vmatpush2.msra.mxu1 %v536_v52  ;;  %v686_v52 = vld [vmem:[%s3243_s4 + $0xb8] sm:$0xff] }
  0x99   : > { %602 = vmatprep.subr.mxu1 %v535_v56  ;;  %v685_v56 = vld [vmem:[%s3243_s4 + $0xb0] sm:$0xff] }
  0x9a   : > { %603 = vmatpush2.msra.mxu1 %v534_v57  ;;  %v684_v57 = vld [vmem:[%s3243_s4 + $0xa8] sm:$0xff] }
  0x9b   : > { %604 = vmatprep.subr.mxu1 %v533_v58  ;;  %v683_v58 = vld [vmem:[%s3243_s4 + $0xa0] sm:$0xff] }
  0x9c   : > { %v1784_v59 = vpop.eup %1783 }
  0x9d   : > { %391 = vperm.xlu1 %1774, %v1784_v59   ;;  %v532_v59 = vld [vmem:[%s3242_s3 + $0x170] sm:$0xff] }
  0x9e   : > { %605 = vmatpush2.msra.mxu1 %v532_v59  ;;  %v682_v59 = vld [vmem:[%s3243_s4 + $0x98] sm:$0xff] }
  0x9f   : > { %606 = vmatprep.subr.mxu1 %v531_v60  ;;  %v681_v60 = vld [vmem:[%s3243_s4 + $0x90] sm:$0xff] }
  0xa0   : > { %607 = vmatpush2.msra.mxu1 %v530_v61  ;;  %v680_v61 = vld [vmem:[%s3243_s4 + $0x88] sm:$0xff] }
  0xa1   : > { %608 = vmatprep.subr.mxu1 %v529_v62  ;;  %v679_v62 = vld [vmem:[%s3243_s4 + $0x80] sm:$0xff] }
  0xa2   : > { %609 = vmatpush2.msra.mxu1 %v528_v63  ;;  %v355_v7 = vpop.permute.xlu0 %354  ;;  %v678_v63 = vld [vmem:[%s3243_s4 + $0x78] sm:$0xff] }
  0xa3   : > { %610 = vmatprep.subr.mxu1 %v527_v0  ;;  %v360_v5 = vpop.permute.xlu1 %359  ;;  %v372_v10 = vmul.f32 %v355_v7, %v348_v8  ;;  %v677_v0 = vld [vmem:[%s3243_s4 + $0x70] sm:$0xff]  ;;  %v670_v7 = vld [vmem:[%s3243_s4 + $0x38] sm:$0xff] }
  0xa4   : > { %611 = vmatpush2.msra.mxu1 %v526_v1  ;;  %v373_v9 = vmul.f32 %v360_v5, %v349_v6  ;;  %v676_v1 = vld [vmem:[%s3243_s4 + $0x68] sm:$0xff]  ;;  %v671_v6 = vld [vmem:[%s3243_s4 + $0x40] sm:$0xff]  ;;  %v669_v8 = vld [vmem:[%s3243_s4 + $0x30] sm:$0xff] }
  0xa5   : > { %612 = vmatprep.subr.mxu1 %v525_v2  ;;  %v377_v14 = vsel %vm376_vm1, %v372_v10, 0.0  ;;  %v675_v2 = vld [vmem:[%s3243_s4 + $0x60] sm:$0xff]  ;;  %v672_v5 = vld [vmem:[%s3243_s4 + $0x48] sm:$0xff] }
  0xa6   : > { %613 = vmatpush2.msra.mxu1 %v524_v3  ;;  %v378_v13 = vsel %vm376_vm1, %v373_v9, 0.0  ;;  %v370_v16 = vpop.permute.xlu0 %369  ;;  %v674_v3 = vld [vmem:[%s3243_s4 + $0x58] sm:$0xff]  ;;  %v668_v9 = vld [vmem:[%s3243_s4 + $0x28] sm:$0xff]  ;;  %v667_v10 = vld [vmem:[%s3243_s4 + $0x20] sm:$0xff] }
  0xa7   : > { %614 = vmatprep.subr.mxu1 %v523_v4  ;;  %v365_v11 = vpop.permute.xlu1 %364  ;;  %v379_v18 = vadd.f32 %v378_v13, %v377_v14  ;;  %v375_v20 = vmul.f32 %v370_v16, %v351_v17  ;;  %v673_v4 = vld [vmem:[%s3243_s4 + $0x50] sm:$0xff]  ;;  %v664_v13 = vld [vmem:[%s3243_s4 + $0x8] sm:$0xff]  ;;  %v663_v14 = vld [vmem:[%s3243_s4] sm:$0xff] }
  0xa8   : > { %v374_v15 = vmul.f32 %v365_v11, %v350_v12  ;;  %615 = vmatpush2.msra.mxu1 %v522_v40  ;;  %v666_v11 = vld [vmem:[%s3243_s4 + $0x18] sm:$0xff]  ;;  %v665_v12 = vld [vmem:[%s3243_s4 + $0x10] sm:$0xff]  ;;  %v724_v17 = vld [vmem:[%s3243_s4 + $0x1e8] sm:$0xff] }
  0xa9   : > { %v382_v25 = vsel %vm376_vm1, %v375_v20, 0.0  ;;  %616 = vmatprep.subr.mxu1 %v521_v41  ;;  %v725_v16 = vld [vmem:[%s3243_s4 + $0x1f0] sm:$0xff] }
  0xaa   : > { %v380_v19 = vsel %vm376_vm1, %v374_v15, 0.0  ;;  %617 = vmatpush2.msra.mxu1 %v520_v42  ;;  %v726_v15 = vld [vmem:[%s3243_s4 + $0x1f8] sm:$0xff]  ;;  %v721_v20 = vld [vmem:[%s3243_s4 + $0x1d0] sm:$0xff] }
  0xab   : > { %v381_v22 = vadd.f32 %v380_v19, %v379_v18  ;;  %618 = vmatprep.subr.mxu1 %v519_v43  ;;  %v723_v18 = vld [vmem:[%s3243_s4 + $0x1e0] sm:$0xff]  ;;  %v722_v19 = vld [vmem:[%s3243_s4 + $0x1d8] sm:$0xff] }
  0xac   : > { %619 = vmatpush2.msra.mxu1 %v518_v44  ;;  %v720_v44 = vld [vmem:[%s3243_s4 + $0x1c8] sm:$0xff] }
  0xad   : > { %v383_v26 = vadd.f32 %v382_v25, %v381_v22  ;;  %885 = vmatprep.subr.mxu1 %v1866_v21 }
 0x118   : > { %v392_v38 = vpop.permute.xlu1 %391 }
 0x119   : > { %v394_v39 = vmul.f32 %v392_v38, %v383_v26 }
 0x11b   : > { %1563 = vmatmul.mubr.msk.f32.vlgmr.msra.gmra.mxu0 %vm411_vm2, %v394_v39  ;;  %v866_v21 = vrot.slane %v394_v39, 1 }
 0x1db   : > { %v481_v45 = vpop.f32.mrf.mxu0 }
 0x1dc   : > { %v482_v50 = vadd.f32 %v481_v45, %v2171_v47  ;;  %v719_v45 = vld [vmem:[%s3243_s4 + $0x1c0] sm:$0xff] }
 0x1dd   : > { %v483_v48 = vpop.f32.mrf.mxu0 }
 0x1de   : > { %v484_v49 = vadd.f32 %v483_v48, %v2166_v46  ;;  %v718_v48 = vld [vmem:[%s3243_s4 + $0x1b8] sm:$0xff] }
 0x1e0   : > { %620 = vmatprep.mubr.f32.mxu1 %v484_v49  ;;  %v717_v49 = vld [vmem:[%s3243_s4 + $0x1b0] sm:$0xff] }
 0x1e1   : > { %621 = vmatmul.mubr.f32.vlgmr.msra.gmra.mxu1 %v482_v50  ;;  %v716_v50 = vld [vmem:[%s3243_s4 + $0x1a8] sm:$0xff] }
 0x1e2   : > { %886 = vmatpush1.msra.mxu1 %v1872_v23  ;;  %933 = vmatprep.mubr.f32.mxu1 %v1801_v55  ;;  %v552_v23 = vrot.slane %v2171_v47, 1  ;;  %v688_v55 = vld [vmem:[%s3243_s4 + $0xc8] sm:$0xff] }
 0x1e3   : > { %887 = vmatprep.subr.mxu1 %v1877_v24  ;;  %v553_v24 = vrot.slane %v2166_v46, 1 }
 0x1e4   : > { %888 = vmatpush1.msra.mxu1 %v1884_v27 }
 0x1e5   : > { %889 = vmatprep.subr.mxu1 %v1889_v28 }
 0x1e6   : > { %890 = vmatpush1.msra.mxu1 %v1895_v29 }
 0x1e7   : > { %891 = vmatprep.subr.mxu1 %v1900_v30 }
 0x1e8   : > { %892 = vmatpush1.msra.mxu1 %v1906_v31 }
 0x1e9   : > { %893 = vmatprep.subr.mxu1 %v1912_v32 }
 0x1ea   : > { %894 = vmatpush1.msra.mxu1 %v1918_v33 }
 0x1eb   : > { %895 = vmatprep.subr.mxu1 %v1924_v34  ;;  %v694_v34 = vld [vmem:[%s3243_s4 + $0xf8] sm:$0xff] }
 0x1ec   : > { %896 = vmatpush1.msra.mxu1 %v1930_v35  ;;  %v693_v35 = vld [vmem:[%s3243_s4 + $0xf0] sm:$0xff]  ;;  %731 = vmatprep.subr.mxu0 %v694_v34 }
 0x1ed   : > { %897 = vmatprep.subr.mxu1 %v1936_v36  ;;  %v692_v36 = vld [vmem:[%s3243_s4 + $0xe8] sm:$0xff]  ;;  %732 = vmatpush1.msra.mxu0 %v693_v35  ;;  %v705_v34 = vld [vmem:[%s3243_s4 + $0x150] sm:$0xff] }
 0x1ee   : > { %898 = vmatpush1.msra.mxu1 %v1942_v37  ;;  %v691_v37 = vld [vmem:[%s3243_s4 + $0xe0] sm:$0xff]  ;;  %733 = vmatprep.subr.mxu0 %v692_v36  ;;  %v704_v35 = vld [vmem:[%s3243_s4 + $0x148] sm:$0xff] }
 0x1ef   : > { %899 = vmatprep.subr.mxu1 %v1954_v53  ;;  %v690_v53 = vld [vmem:[%s3243_s4 + $0xd8] sm:$0xff]  ;;  %734 = vmatpush1.msra.mxu0 %v691_v37  ;;  %v703_v36 = vld [vmem:[%s3243_s4 + $0x140] sm:$0xff] }
 0x1f0   : > { %900 = vmatpush1.msra.mxu1 %v1960_v54  ;;  %v689_v54 = vld [vmem:[%s3243_s4 + $0xd0] sm:$0xff]  ;;  %735 = vmatprep.subr.mxu0 %v690_v53  ;;  %v702_v37 = vld [vmem:[%s3243_s4 + $0x138] sm:$0xff] }
 0x1f1   : > { %1564 = vmatmul.mubr.msk.f32.vlgmr.msra.gmra.mxu1 %vm411_vm2, %v866_v21  ;;  %736 = vmatpush1.msra.mxu0 %v689_v54  ;;  %v715_v21 = vld [vmem:[%s3243_s4 + $0x1a0] sm:$0xff]  ;;  %v701_v53 = vld [vmem:[%s3243_s4 + $0x130] sm:$0xff]  ;;  %v700_v54 = vld [vmem:[%s3243_s4 + $0x128] sm:$0xff] }
 0x1f2   : > { %737 = vmatprep.subr.mxu0 %v688_v55  ;;  %v699_v55 = vld [vmem:[%s3243_s4 + $0x120] sm:$0xff] }
 0x1f3   : > { %738 = vmatpush1.msra.mxu0 %v687_v51  ;;  %v698_v51 = vld [vmem:[%s3243_s4 + $0x118] sm:$0xff] }
 0x1f4   : > { %739 = vmatprep.subr.mxu0 %v686_v52  ;;  %v697_v52 = vld [vmem:[%s3243_s4 + $0x110] sm:$0xff] }
 0x1f5   : > { %740 = vmatpush1.msra.mxu0 %v685_v56  ;;  %v696_v56 = vld [vmem:[%s3243_s4 + $0x108] sm:$0xff] }
 0x1f6   : > { %741 = vmatprep.subr.mxu0 %v684_v57  ;;  %v695_v57 = vld [vmem:[%s3243_s4 + $0x100] sm:$0xff] }
 0x1f7   : > { %742 = vmatpush1.msra.mxu0 %v683_v58  ;;  %v1596_v58 = vld [vmem:[%s3242_s3 + $0x2f8] sm:$0xff] }
 0x1f8   : > { %743 = vmatprep.subr.mxu0 %v682_v59 }
 0x1f9   : > { %744 = vmatpush1.msra.mxu0 %v681_v60 }
 0x1fa   : > { %745 = vmatprep.subr.mxu0 %v680_v61 }
 0x1fb   : > { %746 = vmatpush1.msra.mxu0 %v679_v62  ;;  %v650_v62 = vrot.slane %v2166_v46, 3 }
 0x1fc   : > { %747 = vmatprep.subr.mxu0 %v678_v63  ;;  %v649_v63 = vrot.slane %v2171_v47, 3 }
 0x1fd   : > { %748 = vmatpush1.msra.mxu0 %v677_v0 }
 0x1fe   : > { %749 = vmatprep.subr.mxu0 %v676_v1 }
 0x1ff   : > { %750 = vmatpush1.msra.mxu0 %v675_v2  ;;  %v656_v2 = vrot.slane %v2166_v46, 5 }
 0x200   : > { %751 = vmatprep.subr.mxu0 %v674_v3 }
 0x201   : > { %752 = vmatpush1.msra.mxu0 %v673_v4  ;;  %v655_v4 = vrot.slane %v2171_v47, 5 }
 0x202   : > { %753 = vmatprep.subr.mxu0 %v672_v5 }
 0x203   : > { %754 = vmatpush1.msra.mxu0 %v671_v6 }
 0x204   : > { %755 = vmatprep.subr.mxu0 %v670_v7 }
 0x205   : > { %756 = vmatpush1.msra.mxu0 %v669_v8 }
 0x206   : > { %757 = vmatprep.subr.mxu0 %v668_v9 }
 0x207   : > { %758 = vmatpush1.msra.mxu0 %v667_v10 }
 0x208   : > { %759 = vmatprep.subr.mxu0 %v666_v11 }
 0x209   : > { %760 = vmatpush1.msra.mxu0 %v665_v12 }
 0x20a   : > { %761 = vmatprep.subr.mxu0 %v664_v13  ;;  %v1595_v13 = vld [vmem:[%s3242_s3 + $0x2f0] sm:$0xff] }
 0x20b   : > { %762 = vmatpush1.msra.mxu0 %v663_v14 }
 0x20c   : > { %763 = vmatprep.subr.mxu0 %v726_v15  ;;  %v1594_v15 = vld [vmem:[%s3242_s3 + $0x2e8] sm:$0xff] }
 0x20d   : > { %764 = vmatpush2.msra.mxu0 %v725_v16  ;;  %v1593_v16 = vld [vmem:[%s3242_s3 + $0x2e0] sm:$0xff] }
 0x20e   : > { %765 = vmatprep.subr.mxu0 %v724_v17  ;;  %v1592_v17 = vld [vmem:[%s3242_s3 + $0x2d8] sm:$0xff] }
 0x20f   : > { %766 = vmatpush2.msra.mxu0 %v723_v18  ;;  %v1591_v18 = vld [vmem:[%s3242_s3 + $0x2d0] sm:$0xff] }
 0x210   : > { %767 = vmatprep.subr.mxu0 %v722_v19  ;;  %v1590_v19 = vld [vmem:[%s3242_s3 + $0x2c8] sm:$0xff] }
 0x211   : > { %768 = vmatpush2.msra.mxu0 %v721_v20  ;;  %v1589_v20 = vld [vmem:[%s3242_s3 + $0x2c0] sm:$0xff] }
 0x212   : > { %769 = vmatprep.subr.mxu0 %v720_v44  ;;  %v1579_v44 = vld [vmem:[%s3242_s3 + $0x270] sm:$0xff] }
 0x213   : > { %770 = vmatpush2.msra.mxu0 %v719_v45  ;;  %v1578_v45 = vld [vmem:[%s3242_s3 + $0x268] sm:$0xff] }
 0x214   : > { %771 = vmatprep.subr.mxu0 %v718_v48  ;;  %v1577_v48 = vld [vmem:[%s3242_s3 + $0x260] sm:$0xff] }
 0x215   : > { %772 = vmatpush2.msra.mxu0 %v717_v49  ;;  %v1576_v49 = vld [vmem:[%s3242_s3 + $0x258] sm:$0xff] }
 0x216   : > { %773 = vmatprep.subr.mxu0 %v716_v50  ;;  %v1575_v50 = vld [vmem:[%s3242_s3 + $0x250] sm:$0xff] }
 0x217   : > { %774 = vmatpush2.msra.mxu0 %v715_v21  ;;  %v1574_v21 = vld [vmem:[%s3242_s3 + $0x248] sm:$0xff] }
 0x2a1   : > { %v622_v27 = vpop.f32.mrf.mxu1 }
 0x2a2   : > { %v2194_v28 = vadd.f32 %v622_v27, %v552_v23  ;;  %v714_v23 = vld [vmem:[%s3243_s4 + $0x198] sm:$0xff]  ;;  %v712_v27 = vld [vmem:[%s3243_s4 + $0x188] sm:$0xff] }
 0x2a3   : > { %v624_v29 = vpop.f32.mrf.mxu1  ;;  %775 = vmatprep.subr.mxu0 %v714_v23  ;;  %v1573_v23 = vld [vmem:[%s3242_s3 + $0x240] sm:$0xff] }
 0x2a4   : > { %v2196_v30 = vadd.f32 %v624_v29, %v553_v24  ;;  %v628_v31 = vsel %vm627_vm3, %v2194_v28, 0.0  ;;  %v713_v24 = vld [vmem:[%s3243_s4 + $0x190] sm:$0xff]  ;;  %v710_v29 = vld [vmem:[%s3243_s4 + $0x178] sm:$0xff] }
 0x2a5   : > { %776 = vmatpush2.msra.mxu0 %v713_v24  ;;  %v1572_v24 = vld [vmem:[%s3242_s3 + $0x238] sm:$0xff] }
 0x2a6   : > { %v629_v32 = vsel %vm627_vm3, %v2196_v30, 0.0  ;;  %777 = vmatprep.subr.mxu0 %v712_v27  ;;  %v1571_v27 = vld [vmem:[%s3242_s3 + $0x230] sm:$0xff] }
 0x2a7   : > { %v630_v33 = vadd.f32 %v629_v32, %v628_v31  ;;  %v708_v31 = vld [vmem:[%s3243_s4 + $0x168] sm:$0xff]  ;;  %v707_v32 = vld [vmem:[%s3243_s4 + $0x160] sm:$0xff] }
 0x2a9   : > { %631 = vadd.xlane.f32.xlu0 %v630_v33  ;;  %v706_v33 = vld [vmem:[%s3243_s4 + $0x158] sm:$0xff] }
 0x2b1   : > { %v2415_v5 = vpop.f32.mrf.mxu1 }
 0x2b3   : > { %v937_v10 = vpop.f32.mrf.mxu1 }
 0x2b4   : > { %v938_v14 = vadd.f32 %v937_v10, %v2166_v46  ;;  %v1602_v10 = vld [vmem:[%s3242_s3 + $0x328] sm:$0xff] }
 0x332   : > { %v632_v22 = vpop.xlane.xlu0 %631 }
 0x333   : > { %v634_v25 = vmul.f32 0.00390625, %v632_v22  ;;  %v1588_v22 = vld [vmem:[%s3242_s3 + $0x2b8] sm:$0xff] }
 0x335   : > { %v2317_v26 = vsub.f32 %v2194_v28, %v634_v25  ;;  %v2320_v38 = vsub.f32 %v2196_v30, %v634_v25  ;;  %v711_v28 = vld [vmem:[%s3243_s4 + $0x180] sm:$0xff]  ;;  %v709_v30 = vld [vmem:[%s3243_s4 + $0x170] sm:$0xff] }
 0x336   : > { %778 = vmatpush2.msra.mxu0 %v711_v28  ;;  %v1587_v25 = vld [vmem:[%s3242_s3 + $0x2b0] sm:$0xff]  ;;  %v1570_v28 = vld [vmem:[%s3242_s3 + $0x228] sm:$0xff] }
 0x337   : > { %v637_v39 = vmul.f32 %v2317_v26, %v2317_v26  ;;  %v638_v40 = vmul.f32 %v2320_v38, %v2320_v38  ;;  %779 = vmatprep.subr.mxu0 %v710_v29  ;;  %v1569_v29 = vld [vmem:[%s3242_s3 + $0x220] sm:$0xff] }
 0x338   : > { %780 = vmatpush2.msra.mxu0 %v709_v30  ;;  %v1568_v30 = vld [vmem:[%s3242_s3 + $0x218] sm:$0xff] }
 0x339   : > { %v639_v41 = vsel %vm627_vm3, %v637_v39, 0.0  ;;  %v640_v42 = vsel %vm627_vm3, %v638_v40, 0.0  ;;  %781 = vmatprep.subr.mxu0 %v708_v31  ;;  %v1584_v39 = vld [vmem:[%s3242_s3 + $0x298] sm:$0xff]  ;;  %v1583_v40 = vld [vmem:[%s3242_s3 + $0x290] sm:$0xff] }
 0x33a   : > { %v641_v43 = vadd.f32 %v640_v42, %v639_v41  ;;  %782 = vmatpush2.msra.mxu0 %v707_v32  ;;  %v1582_v41 = vld [vmem:[%s3242_s3 + $0x288] sm:$0xff]  ;;  %v1581_v42 = vld [vmem:[%s3242_s3 + $0x280] sm:$0xff]  ;;  %v1567_v31 = vld [vmem:[%s3242_s3 + $0x210] sm:$0xff] }
 0x33b   : > { %783 = vmatprep.subr.mxu0 %v706_v33  ;;  %v1566_v32 = vld [vmem:[%s3242_s3 + $0x208] sm:$0xff]  ;;  %v1565_v33 = vld [vmem:[%s3242_s3 + $0x200] sm:$0xff] }
 0x33c   : > { %642 = vadd.xlane.f32.xlu1 %v641_v43  ;;  %784 = vmatpush2.msra.mxu0 %v705_v34  ;;  %v1580_v43 = vld [vmem:[%s3242_s3 + $0x278] sm:$0xff] }
 0x33d   : > { %785 = vmatprep.subr.mxu0 %v704_v35  ;;  %v1628_v34 = vld [vmem:[%s3242_s3 + $0x3f8] sm:$0xff]  ;;  %v1627_v35 = vld [vmem:[%s3242_s3 + $0x3f0] sm:$0xff] }
 0x33e   : > { %786 = vmatpush2.msra.mxu0 %v703_v36  ;;  %v1626_v36 = vld [vmem:[%s3242_s3 + $0x3e8] sm:$0xff] }
 0x33f   : > { %787 = vmatprep.subr.mxu0 %v702_v37  ;;  %v1625_v37 = vld [vmem:[%s3242_s3 + $0x3e0] sm:$0xff] }
 0x340   : > { %788 = vmatpush2.msra.mxu0 %v701_v53  ;;  %v1624_v53 = vld [vmem:[%s3242_s3 + $0x3d8] sm:$0xff] }
 0x341   : > { %789 = vmatprep.subr.mxu0 %v700_v54  ;;  %v1623_v54 = vld [vmem:[%s3242_s3 + $0x3d0] sm:$0xff] }
 0x342   : > { %790 = vmatpush2.msra.mxu0 %v699_v55  ;;  %v1622_v55 = vld [vmem:[%s3242_s3 + $0x3c8] sm:$0xff] }
 0x343   : > { %791 = vmatprep.subr.mxu0 %v698_v51  ;;  %v1621_v51 = vld [vmem:[%s3242_s3 + $0x3c0] sm:$0xff] }
 0x344   : > { %792 = vmatpush2.msra.mxu0 %v697_v52  ;;  %v1620_v52 = vld [vmem:[%s3242_s3 + $0x3b8] sm:$0xff] }
 0x345   : > { %793 = vmatprep.subr.mxu0 %v696_v56  ;;  %v1619_v56 = vld [vmem:[%s3242_s3 + $0x3b0] sm:$0xff] }
 0x346   : > { %794 = vmatpush2.msra.mxu0 %v695_v57  ;;  %v1618_v57 = vld [vmem:[%s3242_s3 + $0x3a8] sm:$0xff] }
 0x347   : > { %1009 = vmatprep.subr.mxu0 %v1596_v58  ;;  %v1617_v58 = vld [vmem:[%s3242_s3 + $0x3a0] sm:$0xff] }
 0x3c5   : > { %v643_v59 = vpop.xlane.xlu1 %642 }
 0x3c6   : > { %v644_v60 = vmul.f32 0.00390625, %v643_v59  ;;  %v1616_v59 = vld [vmem:[%s3242_s3 + $0x398] sm:$0xff] }
 0x3c8   : > { %v645_v61 = vadd.f32 1e-05, %v644_v60  ;;  %v1615_v60 = vld [vmem:[%s3242_s3 + $0x390] sm:$0xff] }
 0x3ca   : > { %1785 = vrsqrt.f32 %v645_v61  ;;  %v1614_v61 = vld [vmem:[%s3242_s3 + $0x388] sm:$0xff] }
 0x3d7   : > { %v1786_v0 = vpop.eup %1785 }
 0x3d8   : > { %v648_v1 = vmul.f32 %v1786_v0, %v2320_v38  ;;  %v647_v3 = vmul.f32 %v1786_v0, %v2317_v26  ;;  %v1586_v26 = vld [vmem:[%s3242_s3 + $0x2a8] sm:$0xff]  ;;  %v1585_v38 = vld [vmem:[%s3242_s3 + $0x2a0] sm:$0xff]  ;;  %v1611_v0 = vld [vmem:[%s3242_s3 + $0x370] sm:$0xff] }
 0x3da   : > { %v654_v6 = vmul.f32 %v650_v62, %v648_v1  ;;  %v653_v7 = vmul.f32 %v649_v63, %v647_v3  ;;  %v1613_v62 = vld [vmem:[%s3242_s3 + $0x380] sm:$0xff]  ;;  %v1612_v63 = vld [vmem:[%s3242_s3 + $0x378] sm:$0xff]  ;;  %v1610_v1 = vld [vmem:[%s3242_s3 + $0x368] sm:$0xff] }
 0x3db   : > { %v1608_v3 = vld [vmem:[%s3242_s3 + $0x358] sm:$0xff] }
 0x3dc   : > { %v660_v8 = vadd.f32 %v656_v2, %v654_v6  ;;  %v659_v9 = vadd.f32 %v655_v4, %v653_v7  ;;  %v1609_v2 = vld [vmem:[%s3242_s3 + $0x360] sm:$0xff]  ;;  %v1607_v4 = vld [vmem:[%s3242_s3 + $0x350] sm:$0xff]  ;;  %v1606_v6 = vld [vmem:[%s3242_s3 + $0x348] sm:$0xff] }
 0x3dd   : > { %v1605_v7 = vld [vmem:[%s3242_s3 + $0x340] sm:$0xff] }
 0x3de   : > { %v662_v11 = vmax.f32 %v660_v8, 0.0  ;;  %v661_v12 = vmax.f32 %v659_v9, 0.0  ;;  %v1604_v8 = vld [vmem:[%s3242_s3 + $0x338] sm:$0xff]  ;;  %v1603_v9 = vld [vmem:[%s3242_s3 + $0x330] sm:$0xff] }
 0x3e0   : > { %795 = vmatprep.mubr.f32.mxu0 %v662_v11  ;;  %v1601_v11 = vld [vmem:[%s3242_s3 + $0x320] sm:$0xff] }
 0x3e1   : > { %796 = vmatmul.mubr.f32.vlgmr.msra.gmra.mxu0 %v661_v12  ;;  %v1600_v12 = vld [vmem:[%s3242_s3 + $0x318] sm:$0xff] }
 0x3e2   : > { %1010 = vmatpush1.msra.mxu0 %v1595_v13  ;;  %1073 = vmatprep.mubr.f32.mxu0 %v938_v14  ;;  %v1599_v13 = vld [vmem:[%s3242_s3 + $0x310] sm:$0xff]  ;;  %v1598_v14 = vld [vmem:[%s3242_s3 + $0x308] sm:$0xff] }
 0x3e3   : > { %1011 = vmatprep.subr.mxu0 %v1594_v15  ;;  %v1597_v15 = vld [vmem:[%s3242_s3 + $0x300] sm:$0xff] }
 0x3e4   : > { %1012 = vmatpush1.msra.mxu0 %v1593_v16  ;;  %v936_v16 = vadd.f32 %v2415_v5, %v2171_v47 }
 0x3e5   : > { %1013 = vmatprep.subr.mxu0 %v1592_v17 }
 0x3e6   : > { %1014 = vmatpush1.msra.mxu0 %v1591_v18  ;;  %v1005_v18 = vrot.slane %v2171_v47, 2  ;;  %v1660_v47 = vld [vmem:[%s3243_s4 + $0x2f8] sm:$0xff] }
 0x3e7   : > { %1015 = vmatprep.subr.mxu0 %v1590_v19  ;;  %1179 = vmatprep.subr.mxu1 %v1660_v47  ;;  %v1671_v47 = vld [vmem:[%s3243_s4 + $0x350] sm:$0xff] }
 0x3e8   : > { %1016 = vmatpush1.msra.mxu0 %v1589_v20  ;;  %v1006_v20 = vrot.slane %v2166_v46, 2  ;;  %v1659_v46 = vld [vmem:[%s3243_s4 + $0x2f0] sm:$0xff] }
 0x3e9   : > { %1017 = vmatprep.subr.mxu0 %v1588_v22  ;;  %1180 = vmatpush1.msra.mxu1 %v1659_v46  ;;  %v1670_v46 = vld [vmem:[%s3243_s4 + $0x348] sm:$0xff] }
 0x3ea   : > { %1018 = vmatpush1.msra.mxu0 %v1587_v25 }
 0x3eb   : > { %1019 = vmatprep.subr.mxu0 %v1586_v26 }
 0x3ec   : > { %1020 = vmatpush1.msra.mxu0 %v1585_v38 }
 0x3ed   : > { %1021 = vmatprep.subr.mxu0 %v1584_v39 }
 0x3ee   : > { %1022 = vmatpush1.msra.mxu0 %v1583_v40 }
 0x3ef   : > { %1023 = vmatprep.subr.mxu0 %v1582_v41  ;;  %v1658_v41 = vld [vmem:[%s3243_s4 + $0x2e8] sm:$0xff] }
 0x3f0   : > { %1024 = vmatpush1.msra.mxu0 %v1581_v42  ;;  %v1657_v42 = vld [vmem:[%s3243_s4 + $0x2e0] sm:$0xff]  ;;  %1181 = vmatprep.subr.mxu1 %v1658_v41 }
 0x3f1   : > { %1025 = vmatprep.subr.mxu0 %v1580_v43  ;;  %v1656_v43 = vld [vmem:[%s3243_s4 + $0x2d8] sm:$0xff]  ;;  %1182 = vmatpush1.msra.mxu1 %v1657_v42  ;;  %v1669_v41 = vld [vmem:[%s3243_s4 + $0x340] sm:$0xff] }
 0x3f2   : > { %1026 = vmatpush1.msra.mxu0 %v1579_v44  ;;  %v1655_v44 = vld [vmem:[%s3243_s4 + $0x2d0] sm:$0xff]  ;;  %1183 = vmatprep.subr.mxu1 %v1656_v43  ;;  %v1668_v42 = vld [vmem:[%s3243_s4 + $0x338] sm:$0xff] }
 0x3f3   : > { %1027 = vmatprep.subr.mxu0 %v1578_v45  ;;  %v1654_v45 = vld [vmem:[%s3243_s4 + $0x2c8] sm:$0xff]  ;;  %1184 = vmatpush1.msra.mxu1 %v1655_v44  ;;  %v1667_v43 = vld [vmem:[%s3243_s4 + $0x330] sm:$0xff] }
 0x3f4   : > { %1028 = vmatpush1.msra.mxu0 %v1577_v48  ;;  %v1653_v48 = vld [vmem:[%s3243_s4 + $0x2c0] sm:$0xff]  ;;  %1185 = vmatprep.subr.mxu1 %v1654_v45  ;;  %v1666_v44 = vld [vmem:[%s3243_s4 + $0x328] sm:$0xff] }
 0x3f5   : > { %1029 = vmatprep.subr.mxu0 %v1576_v49  ;;  %v1652_v49 = vld [vmem:[%s3243_s4 + $0x2b8] sm:$0xff]  ;;  %1186 = vmatpush1.msra.mxu1 %v1653_v48  ;;  %v1665_v45 = vld [vmem:[%s3243_s4 + $0x320] sm:$0xff] }
 0x3f6   : > { %1030 = vmatpush1.msra.mxu0 %v1575_v50  ;;  %v1651_v50 = vld [vmem:[%s3243_s4 + $0x2b0] sm:$0xff]  ;;  %1187 = vmatprep.subr.mxu1 %v1652_v49  ;;  %v1664_v48 = vld [vmem:[%s3243_s4 + $0x318] sm:$0xff] }
 0x3f7   : > { %1031 = vmatprep.subr.mxu0 %v1574_v21  ;;  %v1650_v21 = vld [vmem:[%s3243_s4 + $0x2a8] sm:$0xff]  ;;  %1188 = vmatpush1.msra.mxu1 %v1651_v50  ;;  %v1663_v49 = vld [vmem:[%s3243_s4 + $0x310] sm:$0xff] }
 0x3f8   : > { %1032 = vmatpush1.msra.mxu0 %v1573_v23  ;;  %v1649_v23 = vld [vmem:[%s3243_s4 + $0x2a0] sm:$0xff]  ;;  %1189 = vmatprep.subr.mxu1 %v1650_v21  ;;  %v1662_v50 = vld [vmem:[%s3243_s4 + $0x308] sm:$0xff] }
 0x3f9   : > { %1033 = vmatprep.subr.mxu0 %v1572_v24  ;;  %v1648_v24 = vld [vmem:[%s3243_s4 + $0x298] sm:$0xff]  ;;  %1190 = vmatpush1.msra.mxu1 %v1649_v23  ;;  %v1661_v21 = vld [vmem:[%s3243_s4 + $0x300] sm:$0xff] }
 0x3fa   : > { %1034 = vmatpush1.msra.mxu0 %v1571_v27  ;;  %v1647_v27 = vld [vmem:[%s3243_s4 + $0x290] sm:$0xff]  ;;  %1191 = vmatprep.subr.mxu1 %v1648_v24  ;;  %v833_v23 = vld [vmem:[%s3244_s5 + $0xf8] sm:$0xff] }
 0x3fb   : > { %1035 = vmatprep.subr.mxu0 %v1570_v28  ;;  %v1646_v28 = vld [vmem:[%s3243_s4 + $0x288] sm:$0xff]  ;;  %1192 = vmatpush1.msra.mxu1 %v1647_v27  ;;  %v1724_v24 = vld [vmem:[%s3244_s5 + $0x2f8] sm:$0xff]  ;;  %v1723_v27 = vld [vmem:[%s3244_s5 + $0x2f0] sm:$0xff] }
 0x3fc   : > { %1036 = vmatpush1.msra.mxu0 %v1569_v29  ;;  %v1645_v29 = vld [vmem:[%s3243_s4 + $0x280] sm:$0xff]  ;;  %1193 = vmatprep.subr.mxu1 %v1646_v28  ;;  %v1722_v28 = vld [vmem:[%s3244_s5 + $0x2e8] sm:$0xff] }
 0x3fd   : > { %1037 = vmatprep.subr.mxu0 %v1568_v30  ;;  %v1644_v30 = vld [vmem:[%s3243_s4 + $0x278] sm:$0xff]  ;;  %1194 = vmatpush1.msra.mxu1 %v1645_v29  ;;  %v1721_v29 = vld [vmem:[%s3244_s5 + $0x2e0] sm:$0xff] }
 0x3fe   : > { %1038 = vmatpush1.msra.mxu0 %v1567_v31  ;;  %v1643_v31 = vld [vmem:[%s3243_s4 + $0x270] sm:$0xff]  ;;  %1195 = vmatprep.subr.mxu1 %v1644_v30  ;;  %v1720_v30 = vld [vmem:[%s3244_s5 + $0x2d8] sm:$0xff] }
 0x3ff   : > { %1039 = vmatprep.subr.mxu0 %v1566_v32  ;;  %v1642_v32 = vld [vmem:[%s3243_s4 + $0x268] sm:$0xff]  ;;  %1196 = vmatpush1.msra.mxu1 %v1643_v31  ;;  %v1719_v31 = vld [vmem:[%s3244_s5 + $0x2d0] sm:$0xff] }
 0x400   : > { %1040 = vmatpush1.msra.mxu0 %v1565_v33  ;;  %v1641_v33 = vld [vmem:[%s3243_s4 + $0x260] sm:$0xff]  ;;  %1197 = vmatprep.subr.mxu1 %v1642_v32  ;;  %v1718_v32 = vld [vmem:[%s3244_s5 + $0x2c8] sm:$0xff] }
 0x401   : > { %1041 = vmatprep.subr.mxu0 %v1628_v34  ;;  %v1640_v34 = vld [vmem:[%s3243_s4 + $0x258] sm:$0xff]  ;;  %1198 = vmatpush1.msra.mxu1 %v1641_v33  ;;  %v1717_v33 = vld [vmem:[%s3244_s5 + $0x2c0] sm:$0xff] }
 0x402   : > { %1042 = vmatpush2.msra.mxu0 %v1627_v35  ;;  %v1639_v35 = vld [vmem:[%s3243_s4 + $0x250] sm:$0xff]  ;;  %1199 = vmatprep.subr.mxu1 %v1640_v34  ;;  %v1716_v34 = vld [vmem:[%s3244_s5 + $0x2b8] sm:$0xff] }
 0x403   : > { %1043 = vmatprep.subr.mxu0 %v1626_v36  ;;  %v1638_v36 = vld [vmem:[%s3243_s4 + $0x248] sm:$0xff]  ;;  %1200 = vmatpush1.msra.mxu1 %v1639_v35  ;;  %v1715_v35 = vld [vmem:[%s3244_s5 + $0x2b0] sm:$0xff] }
 0x404   : > { %1044 = vmatpush2.msra.mxu0 %v1625_v37  ;;  %v1637_v37 = vld [vmem:[%s3243_s4 + $0x240] sm:$0xff]  ;;  %1201 = vmatprep.subr.mxu1 %v1638_v36  ;;  %v1714_v36 = vld [vmem:[%s3244_s5 + $0x2a8] sm:$0xff] }
 0x405   : > { %1045 = vmatprep.subr.mxu0 %v1624_v53  ;;  %v1636_v53 = vld [vmem:[%s3243_s4 + $0x238] sm:$0xff]  ;;  %1202 = vmatpush1.msra.mxu1 %v1637_v37  ;;  %v1713_v37 = vld [vmem:[%s3244_s5 + $0x2a0] sm:$0xff] }
 0x406   : > { %1046 = vmatpush2.msra.mxu0 %v1623_v54  ;;  %v1635_v54 = vld [vmem:[%s3243_s4 + $0x230] sm:$0xff]  ;;  %1203 = vmatprep.subr.mxu1 %v1636_v53  ;;  %v1712_v53 = vld [vmem:[%s3244_s5 + $0x298] sm:$0xff] }
 0x407   : > { %1047 = vmatprep.subr.mxu0 %v1622_v55  ;;  %v1634_v55 = vld [vmem:[%s3243_s4 + $0x228] sm:$0xff]  ;;  %1204 = vmatpush1.msra.mxu1 %v1635_v54  ;;  %v1711_v54 = vld [vmem:[%s3244_s5 + $0x290] sm:$0xff] }
 0x408   : > { %1048 = vmatpush2.msra.mxu0 %v1621_v51  ;;  %v1633_v51 = vld [vmem:[%s3243_s4 + $0x220] sm:$0xff]  ;;  %1205 = vmatprep.subr.mxu1 %v1634_v55  ;;  %v1710_v55 = vld [vmem:[%s3244_s5 + $0x288] sm:$0xff] }
 0x409   : > { %1049 = vmatprep.subr.mxu0 %v1620_v52  ;;  %v1632_v52 = vld [vmem:[%s3243_s4 + $0x218] sm:$0xff]  ;;  %1206 = vmatpush1.msra.mxu1 %v1633_v51  ;;  %v1709_v51 = vld [vmem:[%s3244_s5 + $0x280] sm:$0xff] }
 0x40a   : > { %1050 = vmatpush2.msra.mxu0 %v1619_v56  ;;  %v1631_v56 = vld [vmem:[%s3243_s4 + $0x210] sm:$0xff]  ;;  %1207 = vmatprep.subr.mxu1 %v1632_v52  ;;  %v1708_v52 = vld [vmem:[%s3244_s5 + $0x278] sm:$0xff] }
 0x40b   : > { %1051 = vmatprep.subr.mxu0 %v1618_v57  ;;  %v1630_v57 = vld [vmem:[%s3243_s4 + $0x208] sm:$0xff]  ;;  %1208 = vmatpush1.msra.mxu1 %v1631_v56  ;;  %v1707_v56 = vld [vmem:[%s3244_s5 + $0x270] sm:$0xff] }
 0x40c   : > { %1052 = vmatpush2.msra.mxu0 %v1617_v58  ;;  %v1629_v58 = vld [vmem:[%s3243_s4 + $0x200] sm:$0xff]  ;;  %1209 = vmatprep.subr.mxu1 %v1630_v57  ;;  %v1706_v57 = vld [vmem:[%s3244_s5 + $0x268] sm:$0xff] }
 0x40d   : > { %1053 = vmatprep.subr.mxu0 %v1616_v59  ;;  %v1692_v59 = vld [vmem:[%s3243_s4 + $0x3f8] sm:$0xff]  ;;  %1210 = vmatpush1.msra.mxu1 %v1629_v58  ;;  %v1705_v58 = vld [vmem:[%s3244_s5 + $0x260] sm:$0xff] }
 0x40e   : > { %1054 = vmatpush2.msra.mxu0 %v1615_v60  ;;  %v1691_v60 = vld [vmem:[%s3243_s4 + $0x3f0] sm:$0xff]  ;;  %1211 = vmatprep.subr.mxu1 %v1692_v59  ;;  %v1704_v59 = vld [vmem:[%s3244_s5 + $0x258] sm:$0xff] }
 0x40f   : > { %1055 = vmatprep.subr.mxu0 %v1614_v61  ;;  %v1690_v61 = vld [vmem:[%s3243_s4 + $0x3e8] sm:$0xff]  ;;  %1212 = vmatpush2.msra.mxu1 %v1691_v60  ;;  %v1703_v60 = vld [vmem:[%s3244_s5 + $0x250] sm:$0xff] }
 0x410   : > { %1056 = vmatpush2.msra.mxu0 %v1613_v62  ;;  %v1689_v62 = vld [vmem:[%s3243_s4 + $0x3e0] sm:$0xff]  ;;  %1213 = vmatprep.subr.mxu1 %v1690_v61  ;;  %v1702_v61 = vld [vmem:[%s3244_s5 + $0x248] sm:$0xff] }
 0x411   : > { %1057 = vmatprep.subr.mxu0 %v1612_v63  ;;  %v1688_v63 = vld [vmem:[%s3243_s4 + $0x3d8] sm:$0xff]  ;;  %1214 = vmatpush2.msra.mxu1 %v1689_v62  ;;  %v1701_v62 = vld [vmem:[%s3244_s5 + $0x240] sm:$0xff] }
 0x412   : > { %1058 = vmatpush2.msra.mxu0 %v1611_v0  ;;  %v1687_v0 = vld [vmem:[%s3243_s4 + $0x3d0] sm:$0xff]  ;;  %1215 = vmatprep.subr.mxu1 %v1688_v63  ;;  %v1700_v63 = vld [vmem:[%s3244_s5 + $0x238] sm:$0xff] }
 0x413   : > { %1059 = vmatprep.subr.mxu0 %v1610_v1  ;;  %1216 = vmatpush2.msra.mxu1 %v1687_v0  ;;  %v1699_v0 = vld [vmem:[%s3244_s5 + $0x230] sm:$0xff] }
 0x414   : > { %1060 = vmatpush2.msra.mxu0 %v1609_v2 }
 0x415   : > { %1061 = vmatprep.subr.mxu0 %v1608_v3 }
 0x416   : > { %1062 = vmatpush2.msra.mxu0 %v1607_v4 }
 0x417   : > { %1063 = vmatprep.subr.mxu0 %v1606_v6 }
 0x418   : > { %1064 = vmatpush2.msra.mxu0 %v1605_v7 }
 0x419   : > { %1065 = vmatprep.subr.mxu0 %v1604_v8 }
 0x41a   : > { %1066 = vmatpush2.msra.mxu0 %v1603_v9 }
 0x41b   : > { %1067 = vmatprep.subr.mxu0 %v1602_v10 }
 0x41c   : > { %1068 = vmatpush2.msra.mxu0 %v1601_v11  ;;  %v1686_v11 = vld [vmem:[%s3243_s4 + $0x3c8] sm:$0xff] }
 0x41d   : > { %1069 = vmatprep.subr.mxu0 %v1600_v12  ;;  %1217 = vmatprep.subr.mxu1 %v1686_v11  ;;  %v1685_v12 = vld [vmem:[%s3243_s4 + $0x3c0] sm:$0xff]  ;;  %v1755_v11 = vld [vmem:[%s3244_s5 + $0x3f0] sm:$0xff] }
 0x41e   : > { %1070 = vmatpush2.msra.mxu0 %v1599_v13  ;;  %1218 = vmatpush2.msra.mxu1 %v1685_v12  ;;  %v1684_v13 = vld [vmem:[%s3243_s4 + $0x3b8] sm:$0xff]  ;;  %v1754_v12 = vld [vmem:[%s3244_s5 + $0x3e8] sm:$0xff] }
 0x41f   : > { %1071 = vmatprep.subr.mxu0 %v1598_v14  ;;  %1219 = vmatprep.subr.mxu1 %v1684_v13  ;;  %v1683_v14 = vld [vmem:[%s3243_s4 + $0x3b0] sm:$0xff]  ;;  %v1753_v13 = vld [vmem:[%s3244_s5 + $0x3e0] sm:$0xff] }
 0x420   : > { %1072 = vmatpush2.msra.mxu0 %v1597_v15  ;;  %1220 = vmatpush2.msra.mxu1 %v1683_v14  ;;  %v1682_v15 = vld [vmem:[%s3243_s4 + $0x3a8] sm:$0xff]  ;;  %v1752_v14 = vld [vmem:[%s3244_s5 + $0x3d8] sm:$0xff] }
 0x421   : > { %1074 = vmatmul.mubr.f32.vlgmr.msra.gmra.mxu0 %v936_v16  ;;  %1221 = vmatprep.subr.mxu1 %v1682_v15  ;;  %v1681_v16 = vld [vmem:[%s3243_s4 + $0x3a0] sm:$0xff]  ;;  %v1751_v15 = vld [vmem:[%s3244_s5 + $0x3d0] sm:$0xff] }
 0x422   : > { %1222 = vmatpush2.msra.mxu1 %v1681_v16  ;;  %1315 = vmatprep.subr.mxu0 %v1724_v24  ;;  %v3001_v24 = vld [vmem:[%s3245_s6] sm:$0xff] }
 0x423   : > { %1316 = vmatpush1.msra.mxu0 %v1723_v27  ;;  %v1100_v27 = vrot.slane %v3001_v24, 4 }
 0x424   : > { %1317 = vmatprep.subr.mxu0 %v1722_v28  ;;  %v1733_v28 = vld [vmem:[%s3244_s5 + $0x340] sm:$0xff] }
 0x425   : > { %1318 = vmatpush1.msra.mxu0 %v1721_v29 }
 0x426   : > { %1319 = vmatprep.subr.mxu0 %v1720_v30  ;;  %v1732_v30 = vld [vmem:[%s3244_s5 + $0x338] sm:$0xff] }
 0x427   : > { %1320 = vmatpush1.msra.mxu0 %v1719_v31 }
 0x428   : > { %1321 = vmatprep.subr.mxu0 %v1718_v32 }
 0x429   : > { %1322 = vmatpush1.msra.mxu0 %v1717_v33 }
 0x42a   : > { %1323 = vmatprep.subr.mxu0 %v1716_v34  ;;  %v1106_v34 = vrot.slane %v3001_v24, 6 }
 0x42b   : > { %1324 = vmatpush1.msra.mxu0 %v1715_v35  ;;  %v1731_v35 = vld [vmem:[%s3244_s5 + $0x330] sm:$0xff] }
 0x42c   : > { %1325 = vmatprep.subr.mxu0 %v1714_v36 }
 0x42d   : > { %1326 = vmatpush1.msra.mxu0 %v1713_v37 }
 0x42e   : > { %1327 = vmatprep.subr.mxu0 %v1712_v53 }
 0x42f   : > { %1328 = vmatpush1.msra.mxu0 %v1711_v54 }
 0x430   : > { %1329 = vmatprep.subr.mxu0 %v1710_v55 }
 0x431   : > { %1330 = vmatpush1.msra.mxu0 %v1709_v51 }
 0x432   : > { %1331 = vmatprep.subr.mxu0 %v1708_v52 }
 0x433   : > { %1332 = vmatpush1.msra.mxu0 %v1707_v56  ;;  %v831_v56 = vld [vmem:[%s3244_s5 + $0xe8] sm:$0xff] }
 0x434   : > { %1333 = vmatprep.subr.mxu0 %v1706_v57  ;;  %v830_v57 = vld [vmem:[%s3244_s5 + $0xe0] sm:$0xff] }
 0x435   : > { %1334 = vmatpush1.msra.mxu0 %v1705_v58  ;;  %v829_v58 = vld [vmem:[%s3244_s5 + $0xd8] sm:$0xff] }
 0x436   : > { %1335 = vmatprep.subr.mxu0 %v1704_v59  ;;  %v827_v59 = vld [vmem:[%s3244_s5 + $0xc8] sm:$0xff] }
 0x437   : > { %1336 = vmatpush1.msra.mxu0 %v1703_v60  ;;  %v826_v60 = vld [vmem:[%s3244_s5 + $0xc0] sm:$0xff] }
 0x438   : > { %1337 = vmatprep.subr.mxu0 %v1702_v61  ;;  %v825_v61 = vld [vmem:[%s3244_s5 + $0xb8] sm:$0xff] }
 0x439   : > { %1338 = vmatpush1.msra.mxu0 %v1701_v62  ;;  %v824_v62 = vld [vmem:[%s3244_s5 + $0xb0] sm:$0xff] }
 0x43a   : > { %1339 = vmatprep.subr.mxu0 %v1700_v63  ;;  %v823_v63 = vld [vmem:[%s3244_s5 + $0xa8] sm:$0xff] }
 0x43b   : > { %1340 = vmatpush1.msra.mxu0 %v1699_v0  ;;  %v822_v0 = vld [vmem:[%s3244_s5 + $0xa0] sm:$0xff] }
 0x4a1   : > { %v2609_v17 = vpop.f32.mrf.mxu0 }
 0x4a3   : > { %v2612_v19 = vpop.f32.mrf.mxu0 }
 0x4e1   : > { %v1075_v22 = vpop.f32.mrf.mxu0 }
 0x4e2   : > { %v2615_v25 = vadd.f32 %v1075_v22, %v1005_v18  ;;  %v1680_v18 = vld [vmem:[%s3243_s4 + $0x398] sm:$0xff]  ;;  %v1678_v22 = vld [vmem:[%s3243_s4 + $0x388] sm:$0xff] }
 0x4e3   : > { %v1077_v26 = vpop.f32.mrf.mxu0  ;;  %1223 = vmatprep.subr.mxu1 %v1680_v18  ;;  %v1750_v18 = vld [vmem:[%s3244_s5 + $0x3c8] sm:$0xff] }
 0x4e4   : > { %v2617_v38 = vadd.f32 %v1077_v26, %v1006_v20  ;;  %v1080_v5 = vsel %vm627_vm3, %v2615_v25, 0.0  ;;  %v1679_v20 = vld [vmem:[%s3243_s4 + $0x390] sm:$0xff]  ;;  %v1676_v26 = vld [vmem:[%s3243_s4 + $0x378] sm:$0xff] }
 0x4e5   : > { %1224 = vmatpush2.msra.mxu1 %v1679_v20 }
 0x4e6   : > { %v1081_v39 = vsel %vm627_vm3, %v2617_v38, 0.0  ;;  %1225 = vmatprep.subr.mxu1 %v1678_v22  ;;  %v1749_v22 = vld [vmem:[%s3244_s5 + $0x3c0] sm:$0xff] }
 0x4e7   : > { %v1082_v40 = vadd.f32 %v1081_v39, %v1080_v5  ;;  %v1674_v5 = vld [vmem:[%s3243_s4 + $0x368] sm:$0xff]  ;;  %v1673_v39 = vld [vmem:[%s3243_s4 + $0x360] sm:$0xff] }
 0x4e9   : > { %1083 = vadd.xlane.f32.xlu0 %v1082_v40  ;;  %v1672_v40 = vld [vmem:[%s3243_s4 + $0x358] sm:$0xff] }
 0x572   : > { %v1084_v1 = vpop.xlane.xlu0 %1083 }
 0x573   : > { %v1085_v2 = vmul.f32 0.00390625, %v1084_v1  ;;  %v1698_v1 = vld [vmem:[%s3244_s5 + $0x228] sm:$0xff] }
 0x574   : > { %1341 = vmatprep.subr.mxu0 %v1698_v1  ;;  %v821_v1 = vld [vmem:[%s3244_s5 + $0x98] sm:$0xff] }
 0x575   : > { %v2738_v3 = vsub.f32 %v2615_v25, %v1085_v2  ;;  %v2741_v4 = vsub.f32 %v2617_v38, %v1085_v2  ;;  %v1677_v25 = vld [vmem:[%s3243_s4 + $0x380] sm:$0xff]  ;;  %v1675_v38 = vld [vmem:[%s3243_s4 + $0x370] sm:$0xff] }
 0x576   : > { %1226 = vmatpush2.msra.mxu1 %v1677_v25  ;;  %v1697_v2 = vld [vmem:[%s3244_s5 + $0x220] sm:$0xff]  ;;  %v1748_v25 = vld [vmem:[%s3244_s5 + $0x3b8] sm:$0xff] }
 0x577   : > { %v1088_v6 = vmul.f32 %v2738_v3, %v2738_v3  ;;  %v1089_v7 = vmul.f32 %v2741_v4, %v2741_v4  ;;  %1227 = vmatprep.subr.mxu1 %v1676_v26  ;;  %1342 = vmatpush1.msra.mxu0 %v1697_v2  ;;  %v820_v2 = vld [vmem:[%s3244_s5 + $0x90] sm:$0xff] }
 0x578   : > { %1228 = vmatpush2.msra.mxu1 %v1675_v38  ;;  %v1747_v38 = vld [vmem:[%s3244_s5 + $0x3b0] sm:$0xff] }
 0x579   : > { %v1090_v8 = vsel %vm627_vm3, %v1088_v6, 0.0  ;;  %v1091_v9 = vsel %vm627_vm3, %v1089_v7, 0.0  ;;  %1229 = vmatprep.subr.mxu1 %v1674_v5  ;;  %v1696_v6 = vld [vmem:[%s3244_s5 + $0x218] sm:$0xff]  ;;  %v1695_v7 = vld [vmem:[%s3244_s5 + $0x210] sm:$0xff]  ;;  %v1746_v5 = vld [vmem:[%s3244_s5 + $0x3a8] sm:$0xff] }
 0x57a   : > { %v1092_v10 = vadd.f32 %v1091_v9, %v1090_v8  ;;  %1230 = vmatpush2.msra.mxu1 %v1673_v39  ;;  %v1694_v8 = vld [vmem:[%s3244_s5 + $0x208] sm:$0xff]  ;;  %1343 = vmatprep.subr.mxu0 %v1696_v6  ;;  %v1693_v9 = vld [vmem:[%s3244_s5 + $0x200] sm:$0xff] }
 0x57b   : > { %1231 = vmatprep.subr.mxu1 %v1672_v40  ;;  %1344 = vmatpush1.msra.mxu0 %v1695_v7  ;;  %v1745_v39 = vld [vmem:[%s3244_s5 + $0x3a0] sm:$0xff]  ;;  %v1744_v40 = vld [vmem:[%s3244_s5 + $0x398] sm:$0xff]  ;;  %v819_v6 = vld [vmem:[%s3244_s5 + $0x88] sm:$0xff] }
 0x57c   : > { %1093 = vadd.xlane.f32.xlu0 %v1092_v10  ;;  %1232 = vmatpush2.msra.mxu1 %v1671_v47  ;;  %v1756_v10 = vld [vmem:[%s3244_s5 + $0x3f8] sm:$0xff]  ;;  %v1743_v47 = vld [vmem:[%s3244_s5 + $0x390] sm:$0xff]  ;;  %v818_v7 = vld [vmem:[%s3244_s5 + $0x80] sm:$0xff] }
 0x57d   : > { %1233 = vmatprep.subr.mxu1 %v1670_v46  ;;  %1345 = vmatprep.subr.mxu0 %v1694_v8  ;;  %v1742_v46 = vld [vmem:[%s3244_s5 + $0x388] sm:$0xff]  ;;  %v817_v8 = vld [vmem:[%s3244_s5 + $0x78] sm:$0xff] }
 0x57e   : > { %1234 = vmatpush2.msra.mxu1 %v1669_v41  ;;  %1346 = vmatpush1.msra.mxu0 %v1693_v9  ;;  %v1741_v41 = vld [vmem:[%s3244_s5 + $0x380] sm:$0xff]  ;;  %v816_v9 = vld [vmem:[%s3244_s5 + $0x70] sm:$0xff] }
 0x57f   : > { %1235 = vmatprep.subr.mxu1 %v1668_v42  ;;  %1347 = vmatprep.subr.mxu0 %v1756_v10  ;;  %v1740_v42 = vld [vmem:[%s3244_s5 + $0x378] sm:$0xff]  ;;  %v815_v10 = vld [vmem:[%s3244_s5 + $0x68] sm:$0xff] }
 0x580   : > { %1236 = vmatpush2.msra.mxu1 %v1667_v43  ;;  %1348 = vmatpush2.msra.mxu0 %v1755_v11  ;;  %v1739_v43 = vld [vmem:[%s3244_s5 + $0x370] sm:$0xff]  ;;  %v814_v11 = vld [vmem:[%s3244_s5 + $0x60] sm:$0xff] }
 0x581   : > { %1237 = vmatprep.subr.mxu1 %v1666_v44  ;;  %1349 = vmatprep.subr.mxu0 %v1754_v12  ;;  %v1738_v44 = vld [vmem:[%s3244_s5 + $0x368] sm:$0xff]  ;;  %v813_v12 = vld [vmem:[%s3244_s5 + $0x58] sm:$0xff] }
 0x582   : > { %1238 = vmatpush2.msra.mxu1 %v1665_v45  ;;  %1350 = vmatpush2.msra.mxu0 %v1753_v13  ;;  %v1737_v45 = vld [vmem:[%s3244_s5 + $0x360] sm:$0xff]  ;;  %v812_v13 = vld [vmem:[%s3244_s5 + $0x50] sm:$0xff] }
 0x583   : > { %1239 = vmatprep.subr.mxu1 %v1664_v48  ;;  %1351 = vmatprep.subr.mxu0 %v1752_v14  ;;  %v1736_v48 = vld [vmem:[%s3244_s5 + $0x358] sm:$0xff]  ;;  %v811_v14 = vld [vmem:[%s3244_s5 + $0x48] sm:$0xff] }
 0x584   : > { %1240 = vmatpush2.msra.mxu1 %v1663_v49  ;;  %1352 = vmatpush2.msra.mxu0 %v1751_v15  ;;  %v1735_v49 = vld [vmem:[%s3244_s5 + $0x350] sm:$0xff]  ;;  %v810_v15 = vld [vmem:[%s3244_s5 + $0x40] sm:$0xff] }
 0x585   : > { %1241 = vmatprep.subr.mxu1 %v1662_v50  ;;  %1353 = vmatprep.subr.mxu0 %v1750_v18  ;;  %v1734_v50 = vld [vmem:[%s3244_s5 + $0x348] sm:$0xff]  ;;  %v808_v18 = vld [vmem:[%s3244_s5 + $0x30] sm:$0xff] }
 0x586   : > { %1242 = vmatpush2.msra.mxu1 %v1661_v21  ;;  %1354 = vmatpush2.msra.mxu0 %v1749_v22  ;;  %v1789_v21 = vld [vmem:[%s3245_s6 + $0x8] sm:$0xff]  ;;  %v806_v22 = vld [vmem:[%s3244_s5 + $0x20] sm:$0xff] }
 0x587   : > { %1386 = vmatprep.subr.mxu1 %v833_v23  ;;  %1355 = vmatprep.subr.mxu0 %v1748_v25  ;;  %v1101_v23 = vrot.slane %v1789_v21, 4  ;;  %v1107_v32 = vrot.slane %v1789_v21, 6  ;;  %v728_v53 = vrot.slane %v1789_v21, 7  ;;  %v805_v25 = vld [vmem:[%s3244_s5 + $0x18] sm:$0xff] }
 0x588   : > { %1356 = vmatpush2.msra.mxu0 %v1747_v38  ;;  %v803_v38 = vld [vmem:[%s3244_s5 + $0x8] sm:$0xff]  ;;  %v853_v21 = vld [vmem:[%s3244_s5 + $0x198] sm:$0xff] }
 0x589   : > { %1357 = vmatprep.subr.mxu0 %v1746_v5  ;;  %v800_v52 = vadd.f32 %v2612_v19, %v728_v53  ;;  %v828_v19 = vld [vmem:[%s3244_s5 + $0xd0] sm:$0xff]  ;;  %v802_v5 = vld [vmem:[%s3244_s5] sm:$0xff] }
 0x58a   : > { %1358 = vmatpush2.msra.mxu0 %v1745_v39  ;;  %v865_v39 = vld [vmem:[%s3244_s5 + $0x1f8] sm:$0xff]  ;;  %v840_v53 = vld [vmem:[%s3244_s5 + $0x130] sm:$0xff] }
 0x58b   : > { %1359 = vmatprep.subr.mxu0 %v1744_v40  ;;  %v864_v40 = vld [vmem:[%s3244_s5 + $0x1f0] sm:$0xff] }
 0x58c   : > { %1360 = vmatpush2.msra.mxu0 %v1743_v47  ;;  %v863_v47 = vld [vmem:[%s3244_s5 + $0x1e8] sm:$0xff] }
 0x58d   : > { %1361 = vmatprep.subr.mxu0 %v1742_v46  ;;  %v862_v46 = vld [vmem:[%s3244_s5 + $0x1e0] sm:$0xff] }
 0x58e   : > { %1362 = vmatpush2.msra.mxu0 %v1741_v41  ;;  %v861_v41 = vld [vmem:[%s3244_s5 + $0x1d8] sm:$0xff] }
 0x58f   : > { %1363 = vmatprep.subr.mxu0 %v1740_v42  ;;  %v860_v42 = vld [vmem:[%s3244_s5 + $0x1d0] sm:$0xff] }
 0x590   : > { %1364 = vmatpush2.msra.mxu0 %v1739_v43  ;;  %v859_v43 = vld [vmem:[%s3244_s5 + $0x1c8] sm:$0xff] }
 0x591   : > { %1365 = vmatprep.subr.mxu0 %v1738_v44  ;;  %v858_v44 = vld [vmem:[%s3244_s5 + $0x1c0] sm:$0xff] }
 0x592   : > { %1366 = vmatpush2.msra.mxu0 %v1737_v45  ;;  %v857_v45 = vld [vmem:[%s3244_s5 + $0x1b8] sm:$0xff] }
 0x593   : > { %1367 = vmatprep.subr.mxu0 %v1736_v48  ;;  %v856_v48 = vld [vmem:[%s3244_s5 + $0x1b0] sm:$0xff] }
 0x594   : > { %1368 = vmatpush2.msra.mxu0 %v1735_v49  ;;  %v855_v49 = vld [vmem:[%s3244_s5 + $0x1a8] sm:$0xff] }
 0x595   : > { %1369 = vmatprep.subr.mxu0 %v1734_v50  ;;  %v854_v50 = vld [vmem:[%s3244_s5 + $0x1a0] sm:$0xff] }
 0x596   : > { %1370 = vmatpush2.msra.mxu0 %v1733_v28  ;;  %v850_v28 = vld [vmem:[%s3244_s5 + $0x180] sm:$0xff] }
 0x597   : > { %1371 = vmatprep.subr.mxu0 %v1732_v30  ;;  %v848_v30 = vld [vmem:[%s3244_s5 + $0x170] sm:$0xff] }
 0x598   : > { %1372 = vmatpush2.msra.mxu0 %v1731_v35  ;;  %v843_v35 = vld [vmem:[%s3244_s5 + $0x148] sm:$0xff] }
 0x605   : > { %v1094_v16 = vpop.xlane.xlu0 %1093 }
 0x606   : > { %v1095_v20 = vmul.f32 0.00390625, %v1094_v16  ;;  %v809_v16 = vld [vmem:[%s3244_s5 + $0x38] sm:$0xff] }
 0x608   : > { %v1096_v26 = vadd.f32 1e-05, %v1095_v20  ;;  %v807_v20 = vld [vmem:[%s3244_s5 + $0x28] sm:$0xff] }
 0x60a   : > { %1787 = vrsqrt.f32 %v1096_v26  ;;  %v804_v26 = vld [vmem:[%s3244_s5 + $0x10] sm:$0xff] }
 0x617   : > { %v1788_v29 = vpop.eup %1787 }
 0x618   : > { %v1099_v31 = vmul.f32 %v1788_v29, %v2741_v4  ;;  %v1098_v33 = vmul.f32 %v1788_v29, %v2738_v3  ;;  %v832_v3 = vld [vmem:[%s3244_s5 + $0xf0] sm:$0xff]  ;;  %v849_v29 = vld [vmem:[%s3244_s5 + $0x178] sm:$0xff] }
 0x61a   : > { %v1105_v36 = vmul.f32 %v1101_v23, %v1099_v31  ;;  %v1104_v37 = vmul.f32 %v1100_v27, %v1098_v33  ;;  %v852_v23 = vld [vmem:[%s3244_s5 + $0x190] sm:$0xff]  ;;  %v851_v27 = vld [vmem:[%s3244_s5 + $0x188] sm:$0xff]  ;;  %v845_v33 = vld [vmem:[%s3244_s5 + $0x158] sm:$0xff] }
 0x61b   : > { %v847_v31 = vld [vmem:[%s3244_s5 + $0x168] sm:$0xff] }
 0x61c   : > { %v1111_v54 = vadd.f32 %v1107_v32, %v1105_v36  ;;  %v1110_v55 = vadd.f32 %v1106_v34, %v1104_v37  ;;  %v846_v32 = vld [vmem:[%s3244_s5 + $0x160] sm:$0xff]  ;;  %v844_v34 = vld [vmem:[%s3244_s5 + $0x150] sm:$0xff]  ;;  %v841_v37 = vld [vmem:[%s3244_s5 + $0x138] sm:$0xff] }
 0x61d   : > { %v842_v36 = vld [vmem:[%s3244_s5 + $0x140] sm:$0xff] }
 0x61e   : > { %v1113_v51 = vmax.f32 %v1111_v54, 0.0  ;;  %v1112_v4 = vmax.f32 %v1110_v55, 0.0  ;;  %v839_v54 = vld [vmem:[%s3244_s5 + $0x128] sm:$0xff]  ;;  %v838_v55 = vld [vmem:[%s3244_s5 + $0x120] sm:$0xff] }
 0x620   : > { %1243 = vmatprep.mubr.f32.mxu1 %v1113_v51  ;;  %v837_v51 = vld [vmem:[%s3244_s5 + $0x118] sm:$0xff] }
 0x621   : > { %1244 = vmatmul.mubr.f32.vlgmr.msra.gmra.mxu1 %v1112_v4  ;;  %v727_v4 = vrot.slane %v3001_v24, 7  ;;  %v1730_v24 = vld [vmem:[%s3244_s5 + $0x328] sm:$0xff] }
 0x622   : > { %1387 = vmatpush1.msra.mxu1 %v832_v3  ;;  %1450 = vmatprep.mubr.f32.mxu1 %v800_v52  ;;  %v836_v3 = vld [vmem:[%s3244_s5 + $0x110] sm:$0xff]  ;;  %v835_v52 = vld [vmem:[%s3244_s5 + $0x108] sm:$0xff] }
 0x623   : > { %1388 = vmatprep.subr.mxu1 %v831_v56  ;;  %v834_v56 = vld [vmem:[%s3244_s5 + $0x100] sm:$0xff]  ;;  %1373 = vmatprep.subr.mxu0 %v1730_v24 }
 0x624   : > { %1389 = vmatpush1.msra.mxu1 %v830_v57  ;;  %v798_v57 = vadd.f32 %v2609_v17, %v727_v4  ;;  %v1727_v17 = vld [vmem:[%s3244_s5 + $0x310] sm:$0xff] }
 0x625   : > { %1390 = vmatprep.subr.mxu1 %v829_v58  ;;  %v1729_v58 = vld [vmem:[%s3244_s5 + $0x320] sm:$0xff] }
 0x626   : > { %1391 = vmatpush1.msra.mxu1 %v828_v19  ;;  %1374 = vmatpush2.msra.mxu0 %v1729_v58  ;;  %v1728_v19 = vld [vmem:[%s3244_s5 + $0x318] sm:$0xff] }
 0x627   : > { %1392 = vmatprep.subr.mxu1 %v827_v59  ;;  %1375 = vmatprep.subr.mxu0 %v1728_v19  ;;  %v1726_v59 = vld [vmem:[%s3244_s5 + $0x308] sm:$0xff] }
 0x628   : > { %1393 = vmatpush1.msra.mxu1 %v826_v60  ;;  %v1725_v60 = vld [vmem:[%s3244_s5 + $0x300] sm:$0xff]  ;;  %1376 = vmatpush2.msra.mxu0 %v1727_v17 }
 0x629   : > { %1394 = vmatprep.subr.mxu1 %v825_v61  ;;  %1377 = vmatprep.subr.mxu0 %v1726_v59 }
 0x62a   : > { %1395 = vmatpush1.msra.mxu1 %v824_v62  ;;  %1378 = vmatpush2.msra.mxu0 %v1725_v60  ;;  %v387_v62 = vld [vmem:[%s3245_s6 + $0x18] sm:$0x3] }
 0x62b   : > { %1396 = vmatprep.subr.mxu1 %v823_v63  ;;  %v386_v63 = vld [vmem:[%s3245_s6 + $0x10] sm:$0x3] }
 0x62c   : > { %1397 = vmatpush1.msra.mxu1 %v822_v0 }
 0x62d   : > { %1398 = vmatprep.subr.mxu1 %v821_v1 }
 0x62e   : > { %1399 = vmatpush1.msra.mxu1 %v820_v2 }
 0x62f   : > { %1400 = vmatprep.subr.mxu1 %v819_v6  ;;  %v1802_v6 = vmov 1966171168  }
 0x630   : > { %1401 = vmatpush1.msra.mxu1 %v818_v7  ;;  %v1469_v7 = vunpack.c.l.s4 %v1802_v6 }
 0x631   : > { %1402 = vmatprep.subr.mxu1 %v817_v8  ;;  %v1471_v8 = vlaneseq }
 0x632   : > { %1403 = vmatpush1.msra.mxu1 %v816_v9 }
 0x633   : > { %1404 = vmatprep.subr.mxu1 %v815_v10  ;;  %v1459_v10 = vrot.slane %v386_v63, 1  ;;  %vm1485_vm4 = vcmp.lt.s32.totalorder %v1471_v8, 256 }
 0x634   : > { %1405 = vmatpush1.msra.mxu1 %v814_v11 }
 0x635   : > { %1406 = vmatprep.subr.mxu1 %v813_v12  ;;  %v1460_v12 = vrot.slane %v387_v62, 1 }
 0x636   : > { %1407 = vmatpush1.msra.mxu1 %v812_v13 }
 0x637   : > { %1408 = vmatprep.subr.mxu1 %v811_v14  ;;  %v1470_v14 = vunpack.c.0.s8 %v1469_v7 }
 0x638   : > { %1409 = vmatpush1.msra.mxu1 %v810_v15  ;;  %v1472_v15 = vshrl.u32 %v1471_v8, 7 }
 0x639   : > { %1410 = vmatprep.subr.mxu1 %v809_v16 }
 0x63a   : > { %1411 = vmatpush1.msra.mxu1 %v808_v18 }
 0x63b   : > { %1412 = vmatprep.subr.mxu1 %v807_v20 }
 0x63c   : > { %1413 = vmatpush1.msra.mxu1 %v806_v22 }
 0x63d   : > { %1414 = vmatprep.subr.mxu1 %v805_v25 }
 0x63e   : > { %1415 = vmatpush1.msra.mxu1 %v804_v26  ;;  %v1473_v26 = vsub.s32 %v1470_v14, %v1472_v15 }
 0x63f   : > { %1416 = vmatprep.subr.mxu1 %v803_v38 }
 0x640   : > { %1417 = vmatpush1.msra.mxu1 %v802_v5 }
 0x641   : > { %1418 = vmatprep.subr.mxu1 %v865_v39 }
 0x642   : > { %1419 = vmatpush2.msra.mxu1 %v864_v40 }
 0x643   : > { %1420 = vmatprep.subr.mxu1 %v863_v47 }
 0x644   : > { %1421 = vmatpush2.msra.mxu1 %v862_v46 }
 0x645   : > { %1422 = vmatprep.subr.mxu1 %v861_v41 }
 0x646   : > { %1423 = vmatpush2.msra.mxu1 %v860_v42 }
 0x647   : > { %1424 = vmatprep.subr.mxu1 %v859_v43 }
 0x648   : > { %1425 = vmatpush2.msra.mxu1 %v858_v44 }
 0x649   : > { %1426 = vmatprep.subr.mxu1 %v857_v45 }
 0x64a   : > { %1427 = vmatpush2.msra.mxu1 %v856_v48 }
 0x64b   : > { %1428 = vmatprep.subr.mxu1 %v855_v49 }
 0x64c   : > { %1429 = vmatpush2.msra.mxu1 %v854_v50 }
 0x64d   : > { %1430 = vmatprep.subr.mxu1 %v853_v21 }
 0x64e   : > { %1431 = vmatpush2.msra.mxu1 %v852_v23 }
 0x64f   : > { %1432 = vmatprep.subr.mxu1 %v851_v27 }
 0x650   : > { %1433 = vmatpush2.msra.mxu1 %v850_v28 }
 0x651   : > { %1434 = vmatprep.subr.mxu1 %v849_v29 }
 0x652   : > { %1435 = vmatpush2.msra.mxu1 %v848_v30 }
 0x653   : > { %1436 = vmatprep.subr.mxu1 %v847_v31 }
 0x654   : > { %1437 = vmatpush2.msra.mxu1 %v846_v32 }
 0x655   : > { %1438 = vmatprep.subr.mxu1 %v845_v33 }
 0x656   : > { %1439 = vmatpush2.msra.mxu1 %v844_v34 }
 0x657   : > { %1440 = vmatprep.subr.mxu1 %v843_v35 }
 0x658   : > { %1441 = vmatpush2.msra.mxu1 %v842_v36 }
 0x659   : > { %1442 = vmatprep.subr.mxu1 %v841_v37 }
 0x65a   : > { %1443 = vmatpush2.msra.mxu1 %v840_v53 }
 0x65b   : > { %1444 = vmatprep.subr.mxu1 %v839_v54 }
 0x65c   : > { %1445 = vmatpush2.msra.mxu1 %v838_v55 }
 0x65d   : > { %1446 = vmatprep.subr.mxu1 %v837_v51 }
 0x65e   : > { %1447 = vmatpush2.msra.mxu1 %v836_v3 }
 0x65f   : > { %1448 = vmatprep.subr.mxu1 %v835_v52 }
 0x660   : > { %1449 = vmatpush2.msra.mxu1 %v834_v56 }
 0x661   : > { %1451 = vmatmul.mubr.f32.vlgmr.msra.gmra.mxu1 %v798_v57 }
 0x6e1   : > { %v1245_v61 = vpop.f32.mrf.mxu1 }
 0x6e2   : > { %v1246_v2 = vadd.f32 %v1245_v61, %v386_v63 }
 0x6e3   : > { %v1247_v0 = vpop.f32.mrf.mxu1 }
 0x6e4   : > { %v1248_v1 = vadd.f32 %v1247_v0, %v387_v62 }
 0x6e6   : > { %1379 = vmatprep.mubr.f32.mxu0 %v1248_v1 }
 0x6e7   : > { %1380 = vmatmul.mubr.f32.vlgmr.msra.gmra.mxu0 %v1246_v2 }
 0x721   : > { %v1452_v9 = vpop.f32.mrf.mxu1 }
 0x723   : > { %v1454_v16 = vpop.f32.mrf.mxu1 }
 0x7a7   : > { %v1381_v11 = vpop.f32.mrf.mxu0 }
 0x7a8   : > { %v1453_v13 = vadd.f32 %v1452_v9, %v1381_v11 }
 0x7a9   : > { %v1383_v18 = vpop.f32.mrf.mxu0 }
 0x7aa   : > { %v1455_v20 = vadd.f32 %v1454_v16, %v1383_v18  ;;  %v1463_v22 = vadd.f32 %v1459_v10, %v1453_v13 }
 0x7ac   : > { %v1464_v25 = vadd.f32 %v1460_v12, %v1455_v20 }
 0x7ae   : > { %v1467_v38 = vcombine.low %v1463_v22, %v1464_v25 }
 0x7b0   : > { %v1474_v5 = vrot.slane %v1467_v38, %v1473_v26 }
 0x7b2   : > { %v1481_v39 = vrot.slane %v1474_v5, %v1473_v26 }
 0x7b4   : > { %1487 = vst.msk [vmem:[%s296_s14] sm:$0x3] %vm1485_vm4, %v1481_v39 }
 0x7b5 PF: > { %s17_s24 = sadd.s32 1, %s1797_s24  }
 0x7b6   : > { %p14_p4 = scmp.ge.s32.totalorder %s17_s24, 4  }
 0x7b8   :  { %16 = sbr.rel (!%p14_p4) target bundleno = 1 (0x1), region = 84 }

</bundles_post_ra>
